<compile_context>
chip_gen: v7x
topology: tpu7x:2x2x1
jax: 0.10.0
libtpu: 0.0.40
codegen_flags: <defaults>
</compile_context>

<pallas_src>
import functools

import jax
import jax.numpy as jnp
from jax import lax
from jax.experimental import pallas as pl
from jax.experimental.pallas import tpu as pltpu

EPS = 1e-5
K = 3  # 3x3 convolution


# ------------------------------ Pallas kernel ------------------------------ #
def _fused_block_kernel(x_ref, mask_ref, w1_ref, b1_ref, w2_ref, b2_ref,
                        o_ref, stk1_ref, stk2_ref, *,
                        n_spatial, shifts, use_norm, residual):
    """Fused UNetBaseBlock (ninner=2) for one batch sample, lane-dense layout.

    x_ref   : (Cin,  P)        zero-padded input, P multiple of 128
    mask_ref: (1,    P)        1.0 on the HxW interior, 0.0 on the pad frame
    w1_ref  : (Cout, 9*Cin)    conv_0 weight, tap-major columns
    b1_ref  : (Cout, 1)        conv_0 bias
    w2_ref  : (Cout, 9*Cout)   conv_1 weight, tap-major columns
    b2_ref  : (Cout, 1)        conv_1 bias
    o_ref   : (Cout, P)        padded-layout output (interior sliced by wrapper)
    stk*_ref: (9*C,  P)        VMEM scratch for the tap-stacked rolled copies
    """
    inv_hw = 1.0 / float(n_spatial)
    mask = mask_ref[...]                               # (1, P)

    def conv3x3(x, w_ref, stk_ref):
        # x: (C, P). Roll-shifted copies land in sublane-offset slices of the
        # scratch; the 3x3 conv is then ONE (Cout, 9*C) @ (9*C, P) MXU matmul.
        C = x.shape[0]
        for t, s in enumerate(shifts):
            xs = x if s == 0 else pltpu.roll(x, s, axis=1)
            stk_ref[t * C:(t + 1) * C, :] = xs
        return jnp.dot(w_ref[...], stk_ref[...],
                       preferred_element_type=jnp.float32,
                       precision=lax.Precision.HIGHEST)

    def inst_norm(y):
        # One-pass masked stats over the HxW interior (biased variance).
        ym = y * mask
        s1 = jnp.sum(ym, axis=1, keepdims=True)
        s2 = jnp.sum(ym * y, axis=1, keepdims=True)
        mean = s1 * inv_hw
        var = jnp.maximum(s2 * inv_hw - mean * mean, 0.0)
        return (y - mean) * lax.rsqrt(var + EPS)

    x = x_ref[...]

    # ---- stage 0: conv_0 (+ norm) ----
    h = conv3x3(x, w1_ref, stk1_ref) + b1_ref[...]
    if use_norm:
        h = inst_norm(h)
    if residual:
        g = h                                   # pre-activation branch
    # activation + re-zero the pad frame so stage 1 sees proper zero padding
    h = jnp.maximum(h, 0.0) * mask

    # ---- stage 1: conv_1 (+ norm) ----
    h = conv3x3(h, w2_ref, stk2_ref) + b2_ref[...]
    if use_norm:
        h = inst_norm(h)

    out = jnp.maximum(g + h, 0.0) if residual else jnp.maximum(h, 0.0)
    o_ref[...] = out.astype(o_ref.dtype)


# -------------------------------- wrapper ----------------------------------- #
def _padded_geometry(H, W):
    """1-px zero border; flattened length rounded up to a multiple of 128."""
    Hp, Wp = H + 2, W + 2
    P = ((Hp * Wp + 127) // 128) * 128
    return Hp, Wp, P


@functools.partial(jax.jit, static_argnames=("residual", "use_norm"))
def unet_base_block_forward(x_nchw, params, *, residual=False, use_norm=True):
    """Forward of UNetBaseBlock (ndim=2, ninner=2). Input/output NCHW."""
    assert len(params) == 2, "fused kernel is specialized to ninner=2"
    (w1, b1), (w2, b2) = params
    N, Cin, H, W = x_nchw.shape
    Cout = w1.shape[-1]
    Hp, Wp, P = _padded_geometry(H, W)
    P0 = Hp * Wp

    # Zero-pad a 1-px frame, flatten, pad trailing lanes to P.  Under jit this
    # collapses into a single fused op feeding the pallas call.
    xpad = jnp.pad(x_nchw.astype(jnp.float32),
                   ((0, 0), (0, 0), (1, 1), (1, 1)))
    xflat = jnp.pad(xpad.reshape(N, Cin, P0), ((0, 0), (0, 0), (0, P - P0)))

    # Interior mask, computed once (constant index_map -> VMEM resident).
    pos = jnp.arange(P, dtype=jnp.int32)
    row, col = pos // Wp, pos % Wp
    mask = (((row >= 1) & (row <= H) & (col >= 1) & (col <= W))
            .astype(jnp.float32))[None, :]

    def stacked(w_hwio):  # (3,3,ci,co) -> (co, 9*ci), tap-major columns
        co = w_hwio.shape[3]
        return jnp.transpose(w_hwio, (3, 0, 1, 2)).reshape(co, -1)

    w1s, w2s = stacked(w1), stacked(w2)
    b1c, b2c = b1.reshape(Cout, 1), b2.reshape(Cout, 1)

    # out[p] needs in[p + d] with d = (ky-1)*Wp + (kx-1)  ->  roll lanes by -d.
    shifts = tuple((-((ky - 1) * Wp + (kx - 1))) % P
                   for ky in range(3) for kx in range(3))

    kern = functools.partial(_fused_block_kernel, n_spatial=H * W,
                             shifts=shifts, use_norm=use_norm,
                             residual=residual)

    out = pl.pallas_call(
        kern,
        out_shape=jax.ShapeDtypeStruct((N, Cout, P), jnp.float32),
        grid_spec=pltpu.PrefetchScalarGridSpec(
            num_scalar_prefetch=0,
            grid=(N,),
            in_specs=[
                pl.BlockSpec((pl.Squeezed(), Cin, P), lambda n: (n, 0, 0)),
                pl.BlockSpec((1, P), lambda n: (0, 0)),
                pl.BlockSpec((Cout, 9 * Cin), lambda n: (0, 0)),
                pl.BlockSpec((Cout, 1), lambda n: (0, 0)),
                pl.BlockSpec((Cout, 9 * Cout), lambda n: (0, 0)),
                pl.BlockSpec((Cout, 1), lambda n: (0, 0)),
            ],
            out_specs=pl.BlockSpec((pl.Squeezed(), Cout, P),
                                   lambda n: (n, 0, 0)),
            scratch_shapes=[pltpu.VMEM((9 * Cin, P), jnp.float32),
                            pltpu.VMEM((9 * Cout, P), jnp.float32)],
        ),
        compiler_params=pltpu.CompilerParams(
            dimension_semantics=("parallel",)),
    )(xflat, mask, w1s, b1c, w2s, b2c)

    # Padded layout back to NCHW: drop trailing lanes, slice the HxW interior
    # (single fused slice/reshape under jit).
    return (out[:, :, :P0].reshape(N, Cout, Hp, Wp)[:, :, 1:H + 1, 1:W + 1])


# ---------------------------- pure-JAX reference ---------------------------- #
def _ref_layer(x_nhwc, w_hwio, b, *, apply_norm, apply_act):
    y = lax.conv_general_dilated(
        x_nhwc, w_hwio, window_strides=(1, 1), padding="SAME",
        dimension_numbers=("NHWC", "HWIO", "NHWC"),
        precision=lax.Precision.HIGHEST)
    y = y + b[None, None, None, :]
    if apply_norm:
        mean = jnp.mean(y, axis=(1, 2), keepdims=True)
        var = jnp.mean((y - mean) ** 2, axis=(1, 2), keepdims=True)
        y = (y - mean) * lax.rsqrt(var + EPS)
    if apply_act:
        y = jnp.maximum(y, 0.0)
    return y


def _ref_forward(x_nchw, params, *, residual=False, use_norm=True):
    (w1, b1), (w2, b2) = params
    h = jnp.transpose(x_nchw, (0, 2, 3, 1))
    if not residual:
        h = _ref_layer(h, w1, b1, apply_norm=use_norm, apply_act=True)
        h = _ref_layer(h, w2, b2, apply_norm=use_norm, apply_act=True)
        out = h
    else:
        g = _ref_layer(h, w1, b1, apply_norm=use_norm, apply_act=False)
        h = jnp.maximum(g, 0.0)
        h = _ref_layer(h, w2, b2, apply_norm=use_norm, apply_act=False)
        out = jnp.maximum(g + h, 0.0)
    return jnp.transpose(out, (0, 3, 1, 2))


# ----------------------------------- main ----------------------------------- #
if __name__ == "__main__":
    N, C_IN, C_OUT, H, W = 2, 4, 8, 16, 16

    key = jax.random.PRNGKey(0)
    kx, k0w, k0b, k1w, k1b = jax.random.split(key, 5)

    x = jax.random.normal(kx, (N, C_IN, H, W), dtype=jnp.float32)  # NCHW

    def make_layer(kw, kb, cin, cout):
        fan_in = K * K * cin
        w = jax.random.normal(kw, (K, K, cin, cout), jnp.float32) / jnp.sqrt(fan_in)
        b = 0.01 * jax.random.normal(kb, (cout,), jnp.float32)
        return w, b

    params = [make_layer(k0w, k0b, C_IN, C_OUT),
              make_layer(k1w, k1b, C_OUT, C_OUT)]

    # residual=False path (default config)
    out = unet_base_block_forward(x, params, residual=False, use_norm=True)
    out = jax.block_until_ready(out)
    ref = _ref_forward(x, params, residual=False, use_norm=True)

    # residual=True path
    out_r = unet_base_block_forward(x, params, residual=True, use_norm=True)
    out_r = jax.block_until_ready(out_r)
    ref_r = _ref_forward(x, params, residual=True, use_norm=True)

    assert out.shape == (N, C_OUT, H, W)
    assert jnp.allclose(out, ref, rtol=1e-3, atol=1e-4), "mismatch (residual=False)"
    assert jnp.allclose(out_r, ref_r, rtol=1e-3, atol=1e-4), "mismatch (residual=True)"

    print("KERNEL_OK")
</pallas_src>

<mosaic_0001>
module attributes {stable_mosaic.version = 11 : i64} {
  func.func @_fused_block_kernel(%arg0: i32, %arg1: memref<1x4x384xf32, #tpu.memory_space<vmem>>, %arg2: memref<1x384xf32, #tpu.memory_space<vmem>>, %arg3: memref<8x36xf32, #tpu.memory_space<vmem>>, %arg4: memref<8x1xf32, #tpu.memory_space<vmem>>, %arg5: memref<8x72xf32, #tpu.memory_space<vmem>>, %arg6: memref<8x1xf32, #tpu.memory_space<vmem>>, %arg7: memref<1x8x384xf32, #tpu.memory_space<vmem>>, %arg8: memref<36x384xf32, #tpu.memory_space<vmem>>, %arg9: memref<72x384xf32, #tpu.memory_space<vmem>>) attributes {dimension_semantics = [#tpu.dimension_semantics<parallel>], iteration_bounds = array<i64: 2>, scalar_prefetch = 0 : i64, scratch_operands = 2 : i64, tpu.core_type = #tpu.core_type<tc>, window_params = [{transform_indices = @transform_0, window_bounds = array<i64: 1, 4, 384>}, {pipeline_mode = #tpu.pipeline_mode<synchronous>, transform_indices = @transform_1, window_bounds = array<i64: 1, 384>}, {pipeline_mode = #tpu.pipeline_mode<synchronous>, transform_indices = @transform_2, window_bounds = array<i64: 8, 36>}, {pipeline_mode = #tpu.pipeline_mode<synchronous>, transform_indices = @transform_3, window_bounds = array<i64: 8, 1>}, {pipeline_mode = #tpu.pipeline_mode<synchronous>, transform_indices = @transform_4, window_bounds = array<i64: 8, 72>}, {pipeline_mode = #tpu.pipeline_mode<synchronous>, transform_indices = @transform_5, window_bounds = array<i64: 8, 1>}, {transform_indices = @transform_6, window_bounds = array<i64: 1, 8, 384>}]} {
    %c0 = arith.constant 0 : index
    %c0_0 = arith.constant 0 : index
    %0 = vector.load %arg2[%c0, %c0_0] : memref<1x384xf32, #tpu.memory_space<vmem>>, vector<1x384xf32>
    %c0_1 = arith.constant 0 : index
    %c0_2 = arith.constant 0 : index
    %c0_3 = arith.constant 0 : index
    %1 = vector.load %arg1[%c0_1, %c0_2, %c0_3] : memref<1x4x384xf32, #tpu.memory_space<vmem>>, vector<1x4x384xf32>
    %2 = vector.shape_cast %1 : vector<1x4x384xf32> to vector<4x384xf32>
    %c19_i32 = arith.constant 19 : i32
    %3 = tpu.dynamic_rotate %2 by %c19_i32 dim 1 : vector<4x384xf32>, i32 -> vector<4x384xf32>
    %c0_4 = arith.constant 0 : index
    %c0_5 = arith.constant 0 : index
    %4 = vector.load %arg8[%c0_4, %c0_5] : memref<36x384xf32, #tpu.memory_space<vmem>>, vector<4x384xf32>
    tpu.vector_store %arg8[%c0_4, %c0_5], %3 {strides = array<i32>} : memref<36x384xf32, #tpu.memory_space<vmem>>, vector<4x384xf32>,
    %c18_i32 = arith.constant 18 : i32
    %5 = tpu.dynamic_rotate %2 by %c18_i32 dim 1 : vector<4x384xf32>, i32 -> vector<4x384xf32>
    %c4 = arith.constant 4 : index
    %c0_6 = arith.constant 0 : index
    %6 = vector.load %arg8[%c4, %c0_6] : memref<36x384xf32, #tpu.memory_space<vmem>>, vector<4x384xf32>
    tpu.vector_store %arg8[%c4, %c0_6], %5 {strides = array<i32>} : memref<36x384xf32, #tpu.memory_space<vmem>>, vector<4x384xf32>,
    %c17_i32 = arith.constant 17 : i32
    %7 = tpu.dynamic_rotate %2 by %c17_i32 dim 1 : vector<4x384xf32>, i32 -> vector<4x384xf32>
    %c8 = arith.constant 8 : index
    %c0_7 = arith.constant 0 : index
    %8 = vector.load %arg8[%c8, %c0_7] : memref<36x384xf32, #tpu.memory_space<vmem>>, vector<4x384xf32>
    tpu.vector_store %arg8[%c8, %c0_7], %7 {strides = array<i32>} : memref<36x384xf32, #tpu.memory_space<vmem>>, vector<4x384xf32>,
    %c1_i32 = arith.constant 1 : i32
    %9 = tpu.dynamic_rotate %2 by %c1_i32 dim 1 : vector<4x384xf32>, i32 -> vector<4x384xf32>
    %c12 = arith.constant 12 : index
    %c0_8 = arith.constant 0 : index
    %10 = vector.load %arg8[%c12, %c0_8] : memref<36x384xf32, #tpu.memory_space<vmem>>, vector<4x384xf32>
    tpu.vector_store %arg8[%c12, %c0_8], %9 {strides = array<i32>} : memref<36x384xf32, #tpu.memory_space<vmem>>, vector<4x384xf32>,
    %c16 = arith.constant 16 : index
    %c0_9 = arith.constant 0 : index
    %11 = vector.load %arg8[%c16, %c0_9] : memref<36x384xf32, #tpu.memory_space<vmem>>, vector<4x384xf32>
    tpu.vector_store %arg8[%c16, %c0_9], %2 {strides = array<i32>} : memref<36x384xf32, #tpu.memory_space<vmem>>, vector<4x384xf32>,
    %c383_i32 = arith.constant 383 : i32
    %12 = tpu.dynamic_rotate %2 by %c383_i32 dim 1 : vector<4x384xf32>, i32 -> vector<4x384xf32>
    %c20 = arith.constant 20 : index
    %c0_10 = arith.constant 0 : index
    %13 = vector.load %arg8[%c20, %c0_10] : memref<36x384xf32, #tpu.memory_space<vmem>>, vector<4x384xf32>
    tpu.vector_store %arg8[%c20, %c0_10], %12 {strides = array<i32>} : memref<36x384xf32, #tpu.memory_space<vmem>>, vector<4x384xf32>,
    %c367_i32 = arith.constant 367 : i32
    %14 = tpu.dynamic_rotate %2 by %c367_i32 dim 1 : vector<4x384xf32>, i32 -> vector<4x384xf32>
    %c24 = arith.constant 24 : index
    %c0_11 = arith.constant 0 : index
    %15 = vector.load %arg8[%c24, %c0_11] : memref<36x384xf32, #tpu.memory_space<vmem>>, vector<4x384xf32>
    tpu.vector_store %arg8[%c24, %c0_11], %14 {strides = array<i32>} : memref<36x384xf32, #tpu.memory_space<vmem>>, vector<4x384xf32>,
    %c366_i32 = arith.constant 366 : i32
    %16 = tpu.dynamic_rotate %2 by %c366_i32 dim 1 : vector<4x384xf32>, i32 -> vector<4x384xf32>
    %c28 = arith.constant 28 : index
    %c0_12 = arith.constant 0 : index
    %17 = vector.load %arg8[%c28, %c0_12] : memref<36x384xf32, #tpu.memory_space<vmem>>, vector<4x384xf32>
    tpu.vector_store %arg8[%c28, %c0_12], %16 {strides = array<i32>} : memref<36x384xf32, #tpu.memory_space<vmem>>, vector<4x384xf32>,
    %c365_i32 = arith.constant 365 : i32
    %18 = tpu.dynamic_rotate %2 by %c365_i32 dim 1 : vector<4x384xf32>, i32 -> vector<4x384xf32>
    %c32 = arith.constant 32 : index
    %c0_13 = arith.constant 0 : index
    %19 = vector.load %arg8[%c32, %c0_13] : memref<36x384xf32, #tpu.memory_space<vmem>>, vector<4x384xf32>
    tpu.vector_store %arg8[%c32, %c0_13], %18 {strides = array<i32>} : memref<36x384xf32, #tpu.memory_space<vmem>>, vector<4x384xf32>,
    %c0_14 = arith.constant 0 : index
    %c0_15 = arith.constant 0 : index
    %20 = vector.load %arg3[%c0_14, %c0_15] : memref<8x36xf32, #tpu.memory_space<vmem>>, vector<8x36xf32>
    %c0_16 = arith.constant 0 : index
    %c0_17 = arith.constant 0 : index
    %21 = vector.load %arg8[%c0_16, %c0_17] : memref<36x384xf32, #tpu.memory_space<vmem>>, vector<36x384xf32>
    %cst = arith.constant dense<0.000000e+00> : vector<8x384xf32>
    %22 = tpu.matmul %20, %21, %cst {dimension_numbers = #tpu.dot_dimension_numbers<[1], [0], [0], [1], [0, 0, 1, 1], [], []>, precision = #tpu.contract_precision<fp32>} : vector<8x36xf32>, vector<36x384xf32>, vector<8x384xf32> -> vector<8x384xf32>
    %c0_18 = arith.constant 0 : index
    %c0_19 = arith.constant 0 : index
    %23 = vector.load %arg4[%c0_18, %c0_19] : memref<8x1xf32, #tpu.memory_space<vmem>>, vector<8x1xf32>
    %24 = vector.broadcast %23 : vector<8x1xf32> to vector<8x384xf32>
    %25 = arith.addf %22, %24 : vector<8x384xf32>
    %26 = vector.broadcast %0 : vector<1x384xf32> to vector<8x384xf32>
    %27 = arith.mulf %25, %26 : vector<8x384xf32>
    %cst_20 = arith.constant dense<0.000000e+00> : vector<8xf32>
    %28 = vector.multi_reduction <add>, %27, %cst_20 [1] : vector<8x384xf32> to vector<8xf32>
    %29 = vector.shape_cast %28 : vector<8xf32> to vector<8x1xf32>
    %30 = arith.mulf %27, %25 : vector<8x384xf32>
    %cst_21 = arith.constant dense<0.000000e+00> : vector<8xf32>
    %31 = vector.multi_reduction <add>, %30, %cst_21 [1] : vector<8x384xf32> to vector<8xf32>
    %32 = vector.shape_cast %31 : vector<8xf32> to vector<8x1xf32>
    %cst_22 = arith.constant 3.906250e-03 : f32
    %33 = vector.broadcast %cst_22 : f32 to vector<8x1xf32>
    %34 = arith.mulf %29, %33 : vector<8x1xf32>
    %cst_23 = arith.constant 3.906250e-03 : f32
    %35 = vector.broadcast %cst_23 : f32 to vector<8x1xf32>
    %36 = arith.mulf %32, %35 : vector<8x1xf32>
    %37 = arith.mulf %34, %34 : vector<8x1xf32>
    %38 = arith.subf %36, %37 : vector<8x1xf32>
    %cst_24 = arith.constant 0.000000e+00 : f32
    %39 = vector.broadcast %cst_24 : f32 to vector<8x1xf32>
    %40 = arith.maximumf %38, %39 : vector<8x1xf32>
    %41 = vector.broadcast %34 : vector<8x1xf32> to vector<8x384xf32>
    %42 = arith.subf %25, %41 : vector<8x384xf32>
    %cst_25 = arith.constant 9.99999974E-6 : f32
    %43 = vector.broadcast %cst_25 : f32 to vector<8x1xf32>
    %44 = arith.addf %40, %43 : vector<8x1xf32>
    %45 = math.rsqrt %44 : vector<8x1xf32>
    %46 = vector.broadcast %45 : vector<8x1xf32> to vector<8x384xf32>
    %47 = arith.mulf %42, %46 : vector<8x384xf32>
    %cst_26 = arith.constant 0.000000e+00 : f32
    %48 = vector.broadcast %cst_26 : f32 to vector<8x384xf32>
    %49 = arith.maximumf %47, %48 : vector<8x384xf32>
    %50 = vector.broadcast %0 : vector<1x384xf32> to vector<8x384xf32>
    %51 = arith.mulf %49, %50 : vector<8x384xf32>
    %c19_i32_27 = arith.constant 19 : i32
    %52 = tpu.dynamic_rotate %51 by %c19_i32_27 dim 1 : vector<8x384xf32>, i32 -> vector<8x384xf32>
    %c0_28 = arith.constant 0 : index
    %c0_29 = arith.constant 0 : index
    %53 = vector.load %arg9[%c0_28, %c0_29] : memref<72x384xf32, #tpu.memory_space<vmem>>, vector<8x384xf32>
    tpu.vector_store %arg9[%c0_28, %c0_29], %52 {strides = array<i32>} : memref<72x384xf32, #tpu.memory_space<vmem>>, vector<8x384xf32>,
    %c18_i32_30 = arith.constant 18 : i32
    %54 = tpu.dynamic_rotate %51 by %c18_i32_30 dim 1 : vector<8x384xf32>, i32 -> vector<8x384xf32>
    %c8_31 = arith.constant 8 : index
    %c0_32 = arith.constant 0 : index
    %55 = vector.load %arg9[%c8_31, %c0_32] : memref<72x384xf32, #tpu.memory_space<vmem>>, vector<8x384xf32>
    tpu.vector_store %arg9[%c8_31, %c0_32], %54 {strides = array<i32>} : memref<72x384xf32, #tpu.memory_space<vmem>>, vector<8x384xf32>,
    %c17_i32_33 = arith.constant 17 : i32
    %56 = tpu.dynamic_rotate %51 by %c17_i32_33 dim 1 : vector<8x384xf32>, i32 -> vector<8x384xf32>
    %c16_34 = arith.constant 16 : index
    %c0_35 = arith.constant 0 : index
    %57 = vector.load %arg9[%c16_34, %c0_35] : memref<72x384xf32, #tpu.memory_space<vmem>>, vector<8x384xf32>
    tpu.vector_store %arg9[%c16_34, %c0_35], %56 {strides = array<i32>} : memref<72x384xf32, #tpu.memory_space<vmem>>, vector<8x384xf32>,
    %c1_i32_36 = arith.constant 1 : i32
    %58 = tpu.dynamic_rotate %51 by %c1_i32_36 dim 1 : vector<8x384xf32>, i32 -> vector<8x384xf32>
    %c24_37 = arith.constant 24 : index
    %c0_38 = arith.constant 0 : index
    %59 = vector.load %arg9[%c24_37, %c0_38] : memref<72x384xf32, #tpu.memory_space<vmem>>, vector<8x384xf32>
    tpu.vector_store %arg9[%c24_37, %c0_38], %58 {strides = array<i32>} : memref<72x384xf32, #tpu.memory_space<vmem>>, vector<8x384xf32>,
    %c32_39 = arith.constant 32 : index
    %c0_40 = arith.constant 0 : index
    %60 = vector.load %arg9[%c32_39, %c0_40] : memref<72x384xf32, #tpu.memory_space<vmem>>, vector<8x384xf32>
    tpu.vector_store %arg9[%c32_39, %c0_40], %51 {strides = array<i32>} : memref<72x384xf32, #tpu.memory_space<vmem>>, vector<8x384xf32>,
    %c383_i32_41 = arith.constant 383 : i32
    %61 = tpu.dynamic_rotate %51 by %c383_i32_41 dim 1 : vector<8x384xf32>, i32 -> vector<8x384xf32>
    %c40 = arith.constant 40 : index
    %c0_42 = arith.constant 0 : index
    %62 = vector.load %arg9[%c40, %c0_42] : memref<72x384xf32, #tpu.memory_space<vmem>>, vector<8x384xf32>
    tpu.vector_store %arg9[%c40, %c0_42], %61 {strides = array<i32>} : memref<72x384xf32, #tpu.memory_space<vmem>>, vector<8x384xf32>,
    %c367_i32_43 = arith.constant 367 : i32
    %63 = tpu.dynamic_rotate %51 by %c367_i32_43 dim 1 : vector<8x384xf32>, i32 -> vector<8x384xf32>
    %c48 = arith.constant 48 : index
    %c0_44 = arith.constant 0 : index
    %64 = vector.load %arg9[%c48, %c0_44] : memref<72x384xf32, #tpu.memory_space<vmem>>, vector<8x384xf32>
    tpu.vector_store %arg9[%c48, %c0_44], %63 {strides = array<i32>} : memref<72x384xf32, #tpu.memory_space<vmem>>, vector<8x384xf32>,
    %c366_i32_45 = arith.constant 366 : i32
    %65 = tpu.dynamic_rotate %51 by %c366_i32_45 dim 1 : vector<8x384xf32>, i32 -> vector<8x384xf32>
    %c56 = arith.constant 56 : index
    %c0_46 = arith.constant 0 : index
    %66 = vector.load %arg9[%c56, %c0_46] : memref<72x384xf32, #tpu.memory_space<vmem>>, vector<8x384xf32>
    tpu.vector_store %arg9[%c56, %c0_46], %65 {strides = array<i32>} : memref<72x384xf32, #tpu.memory_space<vmem>>, vector<8x384xf32>,
    %c365_i32_47 = arith.constant 365 : i32
    %67 = tpu.dynamic_rotate %51 by %c365_i32_47 dim 1 : vector<8x384xf32>, i32 -> vector<8x384xf32>
    %c64 = arith.constant 64 : index
    %c0_48 = arith.constant 0 : index
    %68 = vector.load %arg9[%c64, %c0_48] : memref<72x384xf32, #tpu.memory_space<vmem>>, vector<8x384xf32>
    tpu.vector_store %arg9[%c64, %c0_48], %67 {strides = array<i32>} : memref<72x384xf32, #tpu.memory_space<vmem>>, vector<8x384xf32>,
    %c0_49 = arith.constant 0 : index
    %c0_50 = arith.constant 0 : index
    %69 = vector.load %arg5[%c0_49, %c0_50] : memref<8x72xf32, #tpu.memory_space<vmem>>, vector<8x72xf32>
    %c0_51 = arith.constant 0 : index
    %c0_52 = arith.constant 0 : index
    %70 = vector.load %arg9[%c0_51, %c0_52] : memref<72x384xf32, #tpu.memory_space<vmem>>, vector<72x384xf32>
    %cst_53 = arith.constant dense<0.000000e+00> : vector<8x384xf32>
    %71 = tpu.matmul %69, %70, %cst_53 {dimension_numbers = #tpu.dot_dimension_numbers<[1], [0], [0], [1], [0, 0, 1, 1], [], []>, precision = #tpu.contract_precision<fp32>} : vector<8x72xf32>, vector<72x384xf32>, vector<8x384xf32> -> vector<8x384xf32>
    %c0_54 = arith.constant 0 : index
    %c0_55 = arith.constant 0 : index
    %72 = vector.load %arg6[%c0_54, %c0_55] : memref<8x1xf32, #tpu.memory_space<vmem>>, vector<8x1xf32>
    %73 = vector.broadcast %72 : vector<8x1xf32> to vector<8x384xf32>
    %74 = arith.addf %71, %73 : vector<8x384xf32>
    %75 = vector.broadcast %0 : vector<1x384xf32> to vector<8x384xf32>
    %76 = arith.mulf %74, %75 : vector<8x384xf32>
    %cst_56 = arith.constant dense<0.000000e+00> : vector<8xf32>
    %77 = vector.multi_reduction <add>, %76, %cst_56 [1] : vector<8x384xf32> to vector<8xf32>
    %78 = vector.shape_cast %77 : vector<8xf32> to vector<8x1xf32>
    %79 = arith.mulf %76, %74 : vector<8x384xf32>
    %cst_57 = arith.constant dense<0.000000e+00> : vector<8xf32>
    %80 = vector.multi_reduction <add>, %79, %cst_57 [1] : vector<8x384xf32> to vector<8xf32>
    %81 = vector.shape_cast %80 : vector<8xf32> to vector<8x1xf32>
    %cst_58 = arith.constant 3.906250e-03 : f32
    %82 = vector.broadcast %cst_58 : f32 to vector<8x1xf32>
    %83 = arith.mulf %78, %82 : vector<8x1xf32>
    %cst_59 = arith.constant 3.906250e-03 : f32
    %84 = vector.broadcast %cst_59 : f32 to vector<8x1xf32>
    %85 = arith.mulf %81, %84 : vector<8x1xf32>
    %86 = arith.mulf %83, %83 : vector<8x1xf32>
    %87 = arith.subf %85, %86 : vector<8x1xf32>
    %cst_60 = arith.constant 0.000000e+00 : f32
    %88 = vector.broadcast %cst_60 : f32 to vector<8x1xf32>
    %89 = arith.maximumf %87, %88 : vector<8x1xf32>
    %90 = vector.broadcast %83 : vector<8x1xf32> to vector<8x384xf32>
    %91 = arith.subf %74, %90 : vector<8x384xf32>
    %cst_61 = arith.constant 9.99999974E-6 : f32
    %92 = vector.broadcast %cst_61 : f32 to vector<8x1xf32>
    %93 = arith.addf %89, %92 : vector<8x1xf32>
    %94 = math.rsqrt %93 : vector<8x1xf32>
    %95 = vector.broadcast %94 : vector<8x1xf32> to vector<8x384xf32>
    %96 = arith.mulf %91, %95 : vector<8x384xf32>
    %cst_62 = arith.constant 0.000000e+00 : f32
    %97 = vector.broadcast %cst_62 : f32 to vector<8x384xf32>
    %98 = arith.maximumf %96, %97 : vector<8x384xf32>
    %c0_63 = arith.constant 0 : index
    %c0_64 = arith.constant 0 : index
    %c0_65 = arith.constant 0 : index
    %99 = vector.load %arg7[%c0_63, %c0_64, %c0_65] : memref<1x8x384xf32, #tpu.memory_space<vmem>>, vector<1x8x384xf32>
    %100 = vector.shape_cast %99 : vector<1x8x384xf32> to vector<8x384xf32>
    %101 = vector.shape_cast %98 : vector<8x384xf32> to vector<1x8x384xf32>
    tpu.vector_store %arg7[%c0_63, %c0_64, %c0_65], %101 {strides = array<i32>} : memref<1x8x384xf32, #tpu.memory_space<vmem>>, vector<1x8x384xf32>,
    return
  }
  func.func @transform_0(%arg0: i32) -> (i32, i32, i32) {
    %c0_i32 = arith.constant 0 : i32
    %c0_i32_0 = arith.constant 0 : i32
    %c0_i32_1 = arith.constant 0 : i32
    return %arg0, %c0_i32, %c0_i32_0 : i32, i32, i32
  }
  func.func @transform_1(%arg0: i32) -> (i32, i32) {
    %c0_i32 = arith.constant 0 : i32
    %c0_i32_0 = arith.constant 0 : i32
    %c0_i32_1 = arith.constant 0 : i32
    return %c0_i32, %c0_i32_0 : i32, i32
  }
  func.func @transform_2(%arg0: i32) -> (i32, i32) {
    %c0_i32 = arith.constant 0 : i32
    %c0_i32_0 = arith.constant 0 : i32
    %c0_i32_1 = arith.constant 0 : i32
    return %c0_i32, %c0_i32_0 : i32, i32
  }
  func.func @transform_3(%arg0: i32) -> (i32, i32) {
    %c0_i32 = arith.constant 0 : i32
    %c0_i32_0 = arith.constant 0 : i32
    %c0_i32_1 = arith.constant 0 : i32
    return %c0_i32, %c0_i32_0 : i32, i32
  }
  func.func @transform_4(%arg0: i32) -> (i32, i32) {
    %c0_i32 = arith.constant 0 : i32
    %c0_i32_0 = arith.constant 0 : i32
    %c0_i32_1 = arith.constant 0 : i32
    return %c0_i32, %c0_i32_0 : i32, i32
  }
  func.func @transform_5(%arg0: i32) -> (i32, i32) {
    %c0_i32 = arith.constant 0 : i32
    %c0_i32_0 = arith.constant 0 : i32
    %c0_i32_1 = arith.constant 0 : i32
    return %c0_i32, %c0_i32_0 : i32, i32
  }
  func.func @transform_6(%arg0: i32) -> (i32, i32, i32) {
    %c0_i32 = arith.constant 0 : i32
    %c0_i32_0 = arith.constant 0 : i32
    %c0_i32_1 = arith.constant 0 : i32
    return %arg0, %c0_i32, %c0_i32_0 : i32, i32, i32
  }
}

</mosaic_0001>

<bundles_post_ra>
// kernel: unet_base_block_forward.1
= control target key start
LH: loop header
LB: loop body
LE: loop exit
PB: predicated region body
PF: predicated region fallthrough
CT: control target
= control target key end

     0   :  { %s3693_s21 = smov 0   ;;  %s4650_s0 = inlined_call_operand.vmem [shape: f32[2,4,384], index: 0, kind: input, shape index: {}]   ;;  %s4651_s1 = inlined_call_operand.vmem [shape: f32[1,384], index: 1, kind: input, shape index: {}]   ;;  %s4652_s2 = inlined_call_operand.vmem [shape: f32[8,36], index: 2, kind: input, shape index: {}]   ;;  %s4653_s3 = inlined_call_operand.vmem [shape: f32[8,1], index: 3, kind: input, shape index: {}]   ;;  %s4654_s4 = inlined_call_operand.vmem [shape: f32[8,72], index: 4, kind: input, shape index: {}]   ;;  %s4655_s5 = inlined_call_operand.vmem [shape: f32[8,1], index: 5, kind: input, shape index: {}]   ;;  %s4656_s6 = inlined_call_operand.vmem [shape: f32[2,8,384], index: 6, kind: output, shape index: {}]  }
   0x1 LB: > { %s3003_s22 = sadd.s32 4294967295, %s3644_s21   ;;  %p3007_p0 = scmp.ge.s32.totalorder %s3644_s21, 1  ;;  %s3644_s21 = sphi %s3693_s21, %s16_s21  }
   0x2   : > { %p212_p1 = scmp.lt.s32.totalorder %s3644_s21, 3 }
   0x4   : > { %p213_p2 = pnand %p3007_p0, %p212_p1 }
   0x6   : > { %216 = sbr.rel (%p213_p2) target bundleno = 1290 (0x50a), region = 44 }
   0xd   : > { %p242_p3 = scmp.lt.s32.totalorder %s3003_s22, 1  ;;  %s3646_s27 = smov 1   ;;  %v4669_v3 = vmov 0.0|0.0   ;;  %v4660_v4 = vmov 0.0   ;;  %vm3656_vm0 = vmmov 0   ;;  %v419_v5 = vld [vmem:[%s4653_s3] sm:$0xff]  ;;  %v264_v7 = vlaneseq }
   0xe   : > { %s3647_s28 = smov 18   ;;  %s3648_s29 = smov 19   ;;  %3360 = vmatprep.subr.bf16.mxu1 %v4669_v3  ;;  %513 = vmatprep.mubr.f32.mxu0 %v4660_v4  ;;  %v3657_v6 = vmov 0   ;;  %v403_v44 = vld [vmem:[%s4652_s2] sm:$0xff]  ;;  %vm425_vm6 = vcmask 293888   ;;  %vm429_vm10 = vcmask 1043456  }
   0xf   : > { %s4759_s22 = smov (!%p242_p3, %s3003_s22), 1  ;;  %s3649_s30 = smov 17   ;;  %3118 = vmatprep.mubr.msk.f32.mxu1 %vm3656_vm0, %v4660_v4  ;;  %3632 = vset.pattern.permute.xlu0 %v3657_v6  ;;  %v3739_v8 = vand.u32 127, %v264_v7  ;;  %v427_v51 = vsel %vm425_vm6, %v403_v44, 0  ;;  %vm1688_vm11 = vcmask 588800  }
  0x10   : > { %s3610_s23 = smul.u32 12, %s4759_s22  ;;  %s3651_s7 = smov 127   ;;  %v3781_v62 = vand.u32 4294901760, %v427_v51 }
  0x11   : > { %s3652_s8 = smov 110   ;;  %s3653_s9 = smov 111   ;;  %vm314_vm1 = vcmp.lt.s32.totalorder %v3739_v8, 1  ;;  %vm279_vm2 = vcmp.lt.s32.totalorder %v3739_v8, 18  ;;  %vm266_vm3 = vcmp.lt.s32.totalorder %v3739_v8, 19  ;;  %vm301_vm4 = vcmp.lt.s32.totalorder %v3739_v8, 17 }
  0x12   : > { %s246_s26 = scalar_lea.vmem %s4650_s0, %s3610_s23  ;;  %s3654_s10 = smov 109   ;;  %vm339_vm5 = vcmp.lt.s32.totalorder %v3739_v8, 127  ;;  %vm374_vm7 = vcmp.lt.s32.totalorder %v3739_v8, 110  ;;  %vm361_vm8 = vcmp.lt.s32.totalorder %v3739_v8, 111  ;;  %vm396_vm9 = vcmp.lt.s32.totalorder %v3739_v8, 109 }
  0x13   : > { %v253_v0 = vld [vmem:[%s246_s26] sm:$0xff]  ;;  %v254_v1 = vld [vmem:[%s246_s26 + $0x8] sm:$0xf]  ;;  %s3611_s23 = smul.u32 24, %s4759_s22 }
  0x14   : > { %308 = vrot.lane.b32.xlu1 %v253_v0, %s3646_s27  ;;  %330 = vst [vmem:[#allocation2 + $0x30] sm:$0xf] %v253_v0  ;;  %273 = vrot.lane.b32.xlu0 %v253_v0, %s3647_s28  ;;  %332 = vst [vmem:[#allocation2 + $0x40] sm:$0xf] %v254_v1  ;;  %v256_v2 = vcombine.high %v253_v0, %v253_v0 }
  0x15   : > { %s251_s26 = scalar_lea.vmem %s4656_s6, %s3611_s23 }
  0x16   : > { %331 = vst [vmem:[#allocation2 + $0x38] sm:$0xf] %v256_v2 }
  0x18   : > { %312 = vrot.lane.b32.xlu1 %v254_v1, %s3646_s27  ;;  %277 = vrot.lane.b32.xlu0 %v254_v1, %s3647_s28 }
  0x1c   : > { %310 = vrot.lane.b32.xlu1 %v256_v2, %s3646_s27  ;;  %275 = vrot.lane.b32.xlu0 %v256_v2, %s3647_s28 }
  0x20   : > { %260 = vrot.lane.b32.xlu1 %v256_v2, %s3648_s29  ;;  %258 = vrot.lane.b32.xlu0 %v253_v0, %s3648_s29 }
  0x24   : > { %297 = vrot.lane.b32.xlu1 %v256_v2, %s3649_s30  ;;  %295 = vrot.lane.b32.xlu0 %v253_v0, %s3649_s30 }
  0x28   : > { %299 = vrot.lane.b32.xlu1 %v254_v1, %s3649_s30  ;;  %262 = vrot.lane.b32.xlu0 %v254_v1, %s3648_s29 }
  0x2c   : > { %337 = vrot.lane.b32.xlu1 %v254_v1, %s3651_s7  ;;  %335 = vrot.lane.b32.xlu0 %v256_v2, %s3651_s7 }
  0x30   : > { %372 = vrot.lane.b32.xlu1 %v254_v1, %s3652_s8  ;;  %370 = vrot.lane.b32.xlu0 %v256_v2, %s3652_s8 }
  0x34   : > { %368 = vrot.lane.b32.xlu1 %v253_v0, %s3652_s8  ;;  %333 = vrot.lane.b32.xlu0 %v253_v0, %s3651_s7 }
  0x38   : > { %359 = vrot.lane.b32.xlu1 %v254_v1, %s3653_s9  ;;  %357 = vrot.lane.b32.xlu0 %v256_v2, %s3653_s9 }
  0x3c   : > { %392 = vrot.lane.b32.xlu1 %v256_v2, %s3654_s10  ;;  %355 = vrot.lane.b32.xlu0 %v253_v0, %s3653_s9 }
  0x40   : > { %390 = vrot.lane.b32.xlu1 %v253_v0, %s3654_s10  ;;  %394 = vrot.lane.b32.xlu0 %v254_v1, %s3654_s10 }
  0x44   : > { %422 = vperm.xlu0 %3632, %v419_v5  }
  0x86   : > { %v309_v9 = vpop.permute.xlu1 %308  ;;  %v274_v10 = vpop.permute.xlu0 %273 }
  0x8a   : > { %v313_v11 = vpop.permute.xlu1 %312  ;;  %v278_v12 = vpop.permute.xlu0 %277 }
  0x8b   : > { %v317_v13 = vsel %vm314_vm1, %v313_v11, %v309_v9  ;;  %v282_v14 = vsel %vm279_vm2, %v278_v12, %v274_v10 }
  0x8c   : > { %v321_v15 = vrot.slane %v317_v13, 4  ;;  %v286_v16 = vrot.slane %v282_v14, 4 }
  0x8e   : > { %327 = vst [vmem:[#allocation2 + $0x18] sm:$0xf0] %v321_v15  ;;  %292 = vst [vmem:[#allocation2] sm:$0xf0] %v286_v16  ;;  %v311_v17 = vpop.permute.xlu1 %310  ;;  %v276_v18 = vpop.permute.xlu0 %275  ;;  %v3800_v16 = vsub.f32 %v427_v51, %v3781_v62 }
  0x8f   : > { %v315_v19 = vsel %vm314_vm1, %v311_v17, %v313_v11  ;;  %v316_v20 = vsel %vm314_vm1, %v309_v9, %v311_v17  ;;  %v280_v21 = vsel %vm279_vm2, %v276_v18, %v278_v12  ;;  %v281_v22 = vsel %vm279_vm2, %v274_v10, %v276_v18 }
  0x90   : > { %v322_v23 = vrot.slane %v316_v20, 4  ;;  %v323_v24 = vrot.slane %v315_v19, 4  ;;  %v287_v25 = vrot.slane %v281_v22, 4  ;;  %v288_v26 = vrot.slane %v280_v21, 4 }
  0x92   : > { %328 = vst [vmem:[#allocation2 + $0x20] sm:$0xf0] %v322_v23  ;;  %329 = vst [vmem:[#allocation2 + $0x28] sm:$0xf0] %v323_v24  ;;  %v261_v27 = vpop.permute.xlu1 %260  ;;  %v259_v28 = vpop.permute.xlu0 %258 }
  0x93   : > { %293 = vst [vmem:[#allocation2 + $0x8] sm:$0xf0] %v287_v25  ;;  %294 = vst [vmem:[#allocation2 + $0x10] sm:$0xf0] %v288_v26  ;;  %v268_v29 = vsel %vm266_vm3, %v259_v28, %v261_v27  ;;  %v3816_v26 = vand.u32 4294901760, %v3800_v16 }
  0x94   : > { %271 = vst [vmem:[#allocation2 + $0x8] sm:$0xf] %v268_v29 }
  0x96   : > { %v298_v30 = vpop.permute.xlu1 %297  ;;  %v296_v31 = vpop.permute.xlu0 %295 }
  0x97   : > { %v303_v32 = vsel %vm301_vm4, %v296_v31, %v298_v30 }
  0x98   : > { %306 = vst [vmem:[#allocation2 + $0x20] sm:$0xf] %v303_v32 }
  0x9a   : > { %v300_v33 = vpop.permute.xlu1 %299  ;;  %v263_v34 = vpop.permute.xlu0 %262 }
  0x9b   : > { %v302_v35 = vsel %vm301_vm4, %v298_v30, %v300_v33  ;;  %v304_v36 = vsel %vm301_vm4, %v300_v33, %v296_v31  ;;  %v267_v37 = vsel %vm266_vm3, %v261_v27, %v263_v34  ;;  %v269_v38 = vsel %vm266_vm3, %v263_v34, %v259_v28  ;;  %v405_v39 = vld [vmem:[#allocation2 + $0x8] sm:$0xff] }
  0x9c   : > { %305 = vst [vmem:[#allocation2 + $0x18] sm:$0xf] %v304_v36  ;;  %307 = vst [vmem:[#allocation2 + $0x28] sm:$0xf] %v302_v35  ;;  %v439_v46 = vand.u32 4294901760, %v405_v39 }
  0x9d   : > { %270 = vst [vmem:[#allocation2] sm:$0xf] %v269_v38  ;;  %272 = vst [vmem:[#allocation2 + $0x10] sm:$0xf] %v267_v37  ;;  %v517_v38 = vsub.f32 %v3800_v16, %v3816_v26 }
  0x9e   : > { %v338_v40 = vpop.permute.xlu1 %337  ;;  %v336_v41 = vpop.permute.xlu0 %335  ;;  %v3795_v14 = vsub.f32 %v405_v39, %v439_v46 }
  0x9f   : > { %v340_v42 = vsel %vm339_vm5, %v336_v41, %v338_v40  ;;  %v408_v43 = vld [vmem:[#allocation2 + $0x20] sm:$0xff] }
  0xa0   : > { %v347_v45 = vrot.slane %v340_v42, 4  ;;  %v443_v47 = vand.u32 4294901760, %v408_v43  ;;  %v527_v25 = vand.u32 4294901760, %v3795_v14 }
  0xa2   : > { %353 = vst [vmem:[#allocation2 + $0x38] sm:$0xf0] %v347_v45  ;;  %v373_v48 = vpop.permute.xlu1 %372  ;;  %v371_v49 = vpop.permute.xlu0 %370  ;;  %v3776_v50 = vpack.c.bf16 %v443_v47, %v439_v46  ;;  %v3802_v17 = vsub.f32 %v408_v43, %v443_v47  ;;  %v528_v37 = vsub.f32 %v3795_v14, %v527_v25 }
  0xa3   : > { %v375_v52 = vsel %vm374_vm7, %v371_v49, %v373_v48  ;;  %v407_v54 = vld [vmem:[#allocation2 + $0x18] sm:$0xff]  ;;  %v409_v59 = vld [vmem:[#allocation2 + $0x28] sm:$0xff] }
  0xa4   : > { %v404_v53 = vld [vmem:[#allocation2] sm:$0xff]  ;;  %v406_v55 = vld [vmem:[#allocation2 + $0x10] sm:$0xff]  ;;  %v382_v56 = vrot.slane %v375_v52, 4  ;;  %3313 = vmatprep.subr.bf16.mxu0 %v3776_v50  ;;  %v445_v58 = vand.u32 4294901760, %v407_v54  ;;  %v1012_v61 = vand.u32 4294901760, %v409_v59  ;;  %v539_v29 = vand.u32 4294901760, %v3802_v17 }
  0xa5   : > { %v441_v57 = vand.u32 4294901760, %v404_v53  ;;  %v1009_v60 = vand.u32 4294901760, %v406_v55 }
  0xa6   : > { %388 = vst [vmem:[#allocation2 + $0x50] sm:$0xf0] %v382_v56  ;;  %v369_v63 = vpop.permute.xlu1 %368  ;;  %v334_v0 = vpop.permute.xlu0 %333  ;;  %v3810_v22 = vsub.f32 %v407_v54, %v445_v58  ;;  %v3820_v31 = vsub.f32 %v409_v59, %v1012_v61  ;;  %v540_v45 = vsub.f32 %v3802_v17, %v539_v29 }
  0xa7   : > { %v3783_v1 = vpack.c.bf16 %v445_v58, %v441_v57  ;;  %v376_v2 = vsel %vm374_vm7, %v369_v63, %v371_v49  ;;  %v377_v5 = vsel %vm374_vm7, %v373_v48, %v369_v63  ;;  %v341_v6 = vsel %vm339_vm5, %v334_v0, %v336_v41 }
  0xa8   : > { %v342_v9 = vsel %vm339_vm5, %v338_v40, %v334_v0  ;;  %v381_v10 = vrot.slane %v376_v2, 4  ;;  %v383_v11 = vrot.slane %v377_v5, 4  ;;  %v346_v12 = vrot.slane %v341_v6, 4 }
  0xa9   : > { %v348_v13 = vrot.slane %v342_v9, 4  ;;  %3315 = vmatpush1.bf16.msra.mxu0 %v3783_v1  ;;  %v3797_v15 = vpack.c.bf16 %v1012_v61, %v1009_v60  ;;  %v3804_v18 = vsub.f32 %v404_v53, %v441_v57  ;;  %v3812_v23 = vsub.f32 %v406_v55, %v1009_v60  ;;  %v411_v24 = vld [vmem:[#allocation2 + $0x38] sm:$0xff] }
  0xaa   : > { %387 = vst [vmem:[#allocation2 + $0x48] sm:$0xf0] %v381_v10  ;;  %389 = vst [vmem:[#allocation2 + $0x58] sm:$0xf0] %v383_v11  ;;  %v360_v19 = vpop.permute.xlu1 %359  ;;  %v358_v20 = vpop.permute.xlu0 %357  ;;  %v447_v34 = vand.u32 4294901760, %v411_v24  ;;  %v545_v39 = vand.u32 4294901760, %v3810_v22 }
  0xab   : > { %352 = vst [vmem:[#allocation2 + $0x30] sm:$0xf0] %v346_v12  ;;  %354 = vst [vmem:[#allocation2 + $0x40] sm:$0xf0] %v348_v13  ;;  %3362 = vmatpush3.bf16.msra.mxu1 %v3797_v15  ;;  %v362_v21 = vsel %vm361_vm8, %v358_v20, %v360_v19  ;;  %v533_v30 = vand.u32 4294901760, %v3804_v18  ;;  %v1091_v40 = vand.u32 4294901760, %v3812_v23 }
  0xac   : > { %366 = vst [vmem:[#allocation2 + $0x50] sm:$0xf] %v362_v21  ;;  %3363 = vmatprep.subr.bf16.mxu1 %v4669_v3  ;;  %v1098_v52 = vand.u32 4294901760, %v3820_v31  ;;  %v3849_v54 = vsub.f32 %v411_v24, %v447_v34  ;;  %v546_v57 = vsub.f32 %v3810_v22, %v545_v39  ;;  %v518_v61 = vand.u32 4294901760, %v517_v38 }
  0xad   : > { %v3840_v46 = vsub.f32 %v3804_v18, %v533_v30  ;;  %v1092_v58 = vsub.f32 %v3812_v23, %v1091_v40  ;;  %v529_v2 = vand.u32 4294901760, %v528_v37  ;;  %v541_v5 = vand.u32 4294901760, %v540_v45 }
  0xae   : > { %v393_v27 = vpop.permute.xlu1 %392  ;;  %v356_v28 = vpop.permute.xlu0 %355  ;;  %v1099_v9 = vsub.f32 %v3820_v31, %v1098_v52  ;;  %v551_v12 = vand.u32 4294901760, %v3849_v54 }
  0xaf   : > { %v363_v32 = vsel %vm361_vm8, %v356_v28, %v358_v20  ;;  %v364_v33 = vsel %vm361_vm8, %v360_v19, %v356_v28  ;;  %v535_v6 = vand.u32 4294901760, %v3840_v46  ;;  %v547_v19 = vand.u32 4294901760, %v546_v57 }
  0xb0   : > { %365 = vst [vmem:[#allocation2 + $0x48] sm:$0xf] %v363_v32  ;;  %367 = vst [vmem:[#allocation2 + $0x58] sm:$0xf] %v364_v33  ;;  %v1093_v20 = vand.u32 4294901760, %v1092_v58  ;;  %v3320_v37 = vpack.c.bf16 %v541_v5, %v529_v2 }
  0xb1   : > { %v3322_v5 = vpack.c.bf16 %v547_v19, %v535_v6 }
  0xb2   : > { %v410_v35 = vld [vmem:[#allocation2 + $0x30] sm:$0xff]  ;;  %v412_v36 = vld [vmem:[#allocation2 + $0x40] sm:$0xff]  ;;  %v391_v41 = vpop.permute.xlu1 %390  ;;  %v395_v42 = vpop.permute.xlu0 %394 }
  0xb3   : > { %v449_v43 = vand.u32 4294901760, %v410_v35  ;;  %v1015_v44 = vand.u32 4294901760, %v412_v36  ;;  %v398_v47 = vsel %vm396_vm9, %v391_v41, %v393_v27  ;;  %v397_v48 = vsel %vm396_vm9, %v393_v27, %v395_v42  ;;  %v414_v51 = vld [vmem:[#allocation2 + $0x50] sm:$0xff] }
  0xb4   : > { %v399_v49 = vsel %vm396_vm9, %v395_v42, %v391_v41  ;;  %400 = vst [vmem:[#allocation2 + $0x60] sm:$0xf] %v398_v47  ;;  %401 = vst [vmem:[#allocation2 + $0x68] sm:$0xf] %v397_v48  ;;  %v451_v53 = vand.u32 4294901760, %v414_v51  ;;  %v1100_v48 = vand.u32 4294901760, %v1099_v9 }
  0xb5   : > { %402 = vst [vmem:[#allocation2 + $0x70] sm:$0xf] %v399_v49  ;;  %v3851_v55 = vsub.f32 %v410_v35, %v449_v43  ;;  %v3853_v56 = vsub.f32 %v412_v36, %v1015_v44 }
  0xb6   : > { %v3861_v59 = vpack.c.bf16 %v451_v53, %v447_v34  ;;  %v3863_v60 = vsub.f32 %v414_v51, %v451_v53 }
  0xb7   : > { %v413_v63 = vld [vmem:[#allocation2 + $0x48] sm:$0xff]  ;;  %v415_v0 = vld [vmem:[#allocation2 + $0x58] sm:$0xff]  ;;  %v557_v21 = vand.u32 4294901760, %v3851_v55  ;;  %v1105_v24 = vand.u32 4294901760, %v3853_v56 }
  0xb8   : > { %3317 = vmatprep.subr.bf16.mxu0 %v3861_v59  ;;  %v453_v10 = vand.u32 4294901760, %v413_v63  ;;  %v1018_v11 = vand.u32 4294901760, %v415_v0  ;;  %v563_v13 = vand.u32 4294901760, %v3863_v60 }
  0xb9   : > { %v558_v51 = vsub.f32 %v3851_v55, %v557_v21 }
  0xba   : > { %v3874_v27 = vpack.c.bf16 %v453_v10, %v449_v43  ;;  %v3876_v28 = vsub.f32 %v413_v63, %v453_v10  ;;  %v3878_v32 = vpack.c.bf16 %v1018_v11, %v1015_v44  ;;  %v3880_v33 = vsub.f32 %v415_v0, %v1018_v11 }
  0xbb   : > { %v417_v34 = vld [vmem:[#allocation2 + $0x68] sm:$0xf]  ;;  %v416_v35 = vld [vmem:[#allocation2 + $0x60] sm:$0xf]  ;;  %v564_v38 = vsub.f32 %v3863_v60, %v563_v13  ;;  %v552_v44 = vsub.f32 %v3849_v54, %v551_v12  ;;  %v1106_v0 = vsub.f32 %v3853_v56, %v1105_v24 }
  0xbc   : > { %v418_v36 = vld [vmem:[#allocation2 + $0x70] sm:$0xf]  ;;  %3319 = vmatpush1.bf16.msra.mxu0 %v3874_v27  ;;  %3365 = vmatpush3.bf16.msra.mxu1 %v3878_v32  ;;  %v434_v41 = vsel %vm429_vm10, %v417_v34, 0  ;;  %v431_v42 = vsel %vm429_vm10, %v416_v35, 0  ;;  %v569_v53 = vand.u32 4294901760, %v3876_v28  ;;  %v1112_v57 = vand.u32 4294901760, %v3880_v33 }
  0xbd   : > { %v437_v43 = vsel %vm429_vm10, %v418_v36, 0  ;;  %v3893_v45 = vand.u32 4294901760, %v434_v41  ;;  %3116 = vmatprep.subr.mxu1 %v4660_v4  ;;  %v3896_v46 = vand.u32 4294901760, %v431_v42  ;;  %v565_v49 = vand.u32 4294901760, %v564_v38 }
  0xbe   : > { %v3898_v47 = vand.u32 4294901760, %v437_v43  ;;  %v553_v9 = vand.u32 4294901760, %v552_v44  ;;  %v570_v10 = vsub.f32 %v3876_v28, %v569_v53  ;;  %v1113_v11 = vsub.f32 %v3880_v33, %v1112_v57 }
  0xbf   : > { %456 = vmatprep.subr.mxu0 %v3893_v45  ;;  %v3907_v58 = vsub.f32 %v431_v42, %v3896_v46  ;;  %v3916_v2 = vsub.f32 %v434_v41, %v3893_v45  ;;  %v3367_v34 = vpack.c.bf16 %v1100_v48, %v1093_v20  ;;  %v559_v42 = vand.u32 4294901760, %v558_v51 }
  0xc0   : > { %v3910_v63 = vsub.f32 %v437_v43, %v3898_v47  ;;  %458 = vmatpush1.msra.mxu0 %v3896_v46  ;;  %3117 = vmatpush3.msra.mxu1 %v3898_v47  ;;  %v3324_v6 = vpack.c.bf16 %v565_v49, %v553_v9  ;;  %v571_v19 = vand.u32 4294901760, %v570_v10  ;;  %v1114_v41 = vand.u32 4294901760, %v1113_v11 }
  0xc1   : > { %3321 = vmatprep.subr.bf16.mxu0 %v3320_v37  ;;  %3366 = vmatprep.subr.bf16.mxu1 %v4669_v3  ;;  %v575_v35 = vand.u32 4294901760, %v3916_v2  ;;  %v581_v36 = vand.u32 4294901760, %v3907_v58  ;;  %v1107_v43 = vand.u32 4294901760, %v1106_v0  ;;  %v3330_v9 = vpack.c.bf16 %v3810_v22, %v3804_v18 }
  0xc2   : > { %v1119_v38 = vand.u32 4294901760, %v3910_v63  ;;  %519 = vmatmul.mubr.f32.vlgmr.msra.gmra.mrb[0].mxu0 %v518_v61  ;;  %3119 = vmatmul.mubr.f32.vlgmr.msra.gmra.mrb[0].mxu1 %v518_v61  ;;  %v3326_v44 = vpack.c.bf16 %v571_v19, %v559_v42  ;;  %v3373_v10 = vpack.c.bf16 %v3820_v31, %v3812_v23  ;;  %v3332_v11 = vpack.c.bf16 %v3863_v60, %v3849_v54 }
  0xc3   : > { %3323 = vmatpush1.bf16.msra.mxu0 %v3322_v5  ;;  %3368 = vmatpush3.bf16.msra.mxu1 %v3367_v34  ;;  %v576_v37 = vsub.f32 %v3916_v2, %v575_v35  ;;  %v582_v20 = vsub.f32 %v3907_v58, %v581_v36  ;;  %v3370_v61 = vpack.c.bf16 %v1114_v41, %v1107_v43 }
  0xc4   : > { %3325 = vmatprep.subr.bf16.mxu0 %v3324_v6  ;;  %3369 = vmatprep.subr.bf16.mxu1 %v4669_v3  ;;  %v1120_v49 = vsub.f32 %v3910_v63, %v1119_v38  ;;  %v3328_v5 = vpack.c.bf16 %v3802_v17, %v3795_v14  ;;  %v3334_v34 = vpack.c.bf16 %v3876_v28, %v3851_v55 }
  0xc5   : > { %v577_v48 = vand.u32 4294901760, %v576_v37  ;;  %639 = vmatprep.mubr.f32.mxu0 %v4660_v4  ;;  %3131 = vmatprep.mubr.msk.f32.mxu1 %vm3656_vm0, %v4660_v4  ;;  %v583_v51 = vand.u32 4294901760, %v582_v20  ;;  %v3376_v6 = vpack.c.bf16 %v3880_v33, %v3853_v56  ;;  %v3346_v19 = vpack.c.bf16 %v545_v39, %v533_v30 }
  0xc6   : > { %v1121_v0 = vand.u32 4294901760, %v1120_v49  ;;  %v3385_v14 = vpack.c.bf16 %v1098_v52, %v1091_v40  ;;  %v3348_v17 = vpack.c.bf16 %v563_v13, %v551_v12  ;;  %v3350_v18 = vpack.c.bf16 %v569_v53, %v557_v21 }
  0xc7   : > { %3327 = vmatpush1.bf16.msra.mxu0 %v3326_v44  ;;  %3371 = vmatpush3.bf16.msra.mxu1 %v3370_v61  ;;  %v3388_v22 = vpack.c.bf16 %v1112_v57, %v1105_v24 }
  0xc8   : > { %578 = vmatprep.subr.mxu0 %v577_v48  ;;  %3129 = vmatprep.subr.mxu1 %v4660_v4 }
  0xcb   : > { %584 = vmatpush1.msra.mxu0 %v583_v51  ;;  %3130 = vmatpush3.msra.mxu1 %v1121_v0  ;;  %v1682_v51 = vld [vmem:[%s4655_s5] sm:$0xff] }
  0xcc   : > { %3329 = vmatprep.subr.bf16.mxu0 %v3328_v5  ;;  %3372 = vmatprep.subr.bf16.mxu1 %v4669_v3 }
  0xcd   : > { %641 = vmatmul.mubr.f32.vlgmr.msra.gmra.mrb[0].mxu0 %v3781_v62  ;;  %3132 = vmatmul.mubr.f32.vlgmr.msra.gmra.mrb[0].mxu1 %v3781_v62 }
  0xce   : > { %3331 = vmatpush1.bf16.msra.mxu0 %v3330_v9  ;;  %3374 = vmatpush3.bf16.msra.mxu1 %v3373_v10 }
  0xcf   : > { %3333 = vmatprep.subr.bf16.mxu0 %v3332_v11  ;;  %3375 = vmatprep.subr.bf16.mxu1 %v4669_v3 }
  0xd0   : > { %731 = vmatprep.mubr.f32.mxu0 %v4660_v4  ;;  %3144 = vmatprep.mubr.msk.f32.mxu1 %vm3656_vm0, %v4660_v4 }
  0xd2   : > { %3335 = vmatpush1.bf16.msra.mxu0 %v3334_v34  ;;  %3377 = vmatpush3.bf16.msra.mxu1 %v3376_v6 }
  0xd3   : > { %673 = vmatprep.subr.mxu0 %v3916_v2  ;;  %3142 = vmatprep.subr.mxu1 %v4660_v4 }
  0xd6   : > { %676 = vmatpush1.msra.mxu0 %v3907_v58  ;;  %3143 = vmatpush3.msra.mxu1 %v3910_v63 }
  0xd7   : > { %3337 = vmatprep.subr.bf16.mxu0 %v3776_v50  ;;  %3378 = vmatprep.subr.bf16.mxu1 %v4669_v3 }
  0xd8   : > { %734 = vmatmul.mubr.f32.vlgmr.msra.gmra.mrb[0].mxu0 %v3800_v16  ;;  %3145 = vmatmul.mubr.f32.vlgmr.msra.gmra.mrb[0].mxu1 %v3800_v16  ;;  %v3344_v16 = vpack.c.bf16 %v539_v29, %v527_v25 }
  0xd9   : > { %3339 = vmatpush1.bf16.msra.mxu0 %v3783_v1  ;;  %3380 = vmatpush3.bf16.msra.mxu1 %v3797_v15 }
  0xda   : > { %3341 = vmatprep.subr.bf16.mxu0 %v3861_v59  ;;  %3381 = vmatprep.subr.bf16.mxu1 %v4669_v3 }
  0xdb   : > { %814 = vmatprep.mubr.f32.mxu0 %v4660_v4  ;;  %3157 = vmatprep.mubr.msk.f32.mxu1 %vm3656_vm0, %v4660_v4 }
  0xdd   : > { %3343 = vmatpush1.bf16.msra.mxu0 %v3874_v27  ;;  %3383 = vmatpush3.bf16.msra.mxu1 %v3878_v32 }
  0xde   : > { %757 = vmatprep.subr.mxu0 %v3893_v45  ;;  %3155 = vmatprep.subr.mxu1 %v4660_v4 }
  0xe1   : > { %759 = vmatpush1.msra.mxu0 %v3896_v46  ;;  %3156 = vmatpush3.msra.mxu1 %v3898_v47 }
  0xe2   : > { %3345 = vmatprep.subr.bf16.mxu0 %v3344_v16  ;;  %3384 = vmatprep.subr.bf16.mxu1 %v4669_v3 }
  0xe3   : > { %818 = vmatmul.mubr.f32.vlgmr.msra.gmra.mrb[0].mxu0 %v3816_v26  ;;  %3158 = vmatmul.mubr.f32.vlgmr.msra.gmra.mrb[0].mxu1 %v3816_v26  ;;  %v423_v26 = vpop.permute.xlu0 %422 }
  0xe4   : > { %3347 = vmatpush1.bf16.msra.mxu0 %v3346_v19  ;;  %3386 = vmatpush3.bf16.msra.mxu1 %v3385_v14 }
  0xe5   : > { %3349 = vmatprep.subr.bf16.mxu0 %v3348_v17  ;;  %3387 = vmatprep.subr.bf16.mxu1 %v4669_v3 }
  0xe6   : > { %918 = vmatprep.mubr.f32.mxu0 %v4660_v4  ;;  %3170 = vmatprep.mubr.msk.f32.mxu1 %vm3656_vm0, %v4660_v4 }
  0xe8   : > { %3351 = vmatpush1.bf16.msra.mxu0 %v3350_v18  ;;  %3389 = vmatpush3.bf16.msra.mxu1 %v3388_v22 }
  0xe9   : > { %859 = vmatprep.subr.mxu0 %v575_v35  ;;  %3168 = vmatprep.subr.mxu1 %v4660_v4 }
  0xec   : > { %863 = vmatpush1.msra.mxu0 %v581_v36  ;;  %3169 = vmatpush3.msra.mxu1 %v1119_v38 }
  0xed   : > { %3353 = vmatprep.subr.bf16.mxu0 %v3776_v50  ;;  %3390 = vmatprep.subr.bf16.mxu1 %v4669_v3  ;;  %v1508_v50 = vshrl.u32 %v264_v7, 7 }
  0xee   : > { %920 = vmatmul.mubr.f32.vlgmr.msra.gmra.mrb[0].mxu0 %v3781_v62  ;;  %3171 = vmatmul.mubr.f32.vlgmr.msra.gmra.mrb[0].mxu1 %v3781_v62 }
  0xef   : > { %3355 = vmatpush1.bf16.msra.mxu0 %v3783_v1  ;;  %3392 = vmatpush3.bf16.msra.mxu1 %v3797_v15  ;;  %v1509_v1 = vsub.s32 0, %v1508_v50  ;;  %v252_v15 = vld [vmem:[%s4651_s1] sm:$0x7]  ;;  %v1513_v23 = vsub.s32 1, %v1508_v50  ;;  %v1517_v25 = vsub.s32 2, %v1508_v50 }
  0xf0   : > { %3357 = vmatprep.subr.bf16.mxu0 %v3861_v59  ;;  %3393 = vmatprep.subr.bf16.mxu1 %v4669_v3 }
  0xf1   : > { %1000 = vmatprep.mubr.f32.mxu0 %v4660_v4  ;;  %3183 = vmatprep.mubr.msk.f32.mxu1 %vm3656_vm0, %v4660_v4  ;;  %v4049_v29 = vrot.slane %v252_v15, %v1509_v1  ;;  %v4051_v31 = vrot.slane %v252_v15, %v1513_v23  ;;  %v4053_v39 = vrot.slane %v252_v15, %v1517_v25  ;;  %v1654_v15 = vld [vmem:[%s4654_s4] sm:$0xff] }
  0xf3   : > { %3359 = vmatpush1.bf16.msra.mxu0 %v3874_v27  ;;  %3395 = vmatpush3.bf16.msra.mxu1 %v3878_v32  ;;  %4695 = vst [vmem:[#allocation4_spill] sm:$0xff] %v4049_v29  ;;  %4696 = vst [vmem:[#allocation5_spill] sm:$0xff] %v4051_v31 }
  0xf4   : > { %943 = vmatprep.subr.mxu0 %v3893_v45  ;;  %3181 = vmatprep.subr.mxu1 %v4660_v4  ;;  %4697 = vst [vmem:[#allocation6_spill] sm:$0xff] %v4053_v39 }
  0xf7   : > { %945 = vmatpush1.msra.mxu0 %v3896_v46  ;;  %3182 = vmatpush3.msra.mxu1 %v3898_v47 }
  0xf8   : > { %1002 = vmatmul.mubr.f32.vlgmr.msra.gmra.mrb[0].mxu0 %v3781_v62  ;;  %3184 = vmatmul.mubr.f32.vlgmr.msra.gmra.mrb[0].mxu1 %v3781_v62 }
  0xf9   : > { %3492 = vmatprep.subr.bf16.mxu1 %v4669_v3  ;;  %1774 = vmatprep.mubr.f32.mxu0 %v4660_v4 }
  0xfa   : > { %3204 = vmatprep.mubr.msk.f32.mxu1 %vm3656_vm0, %v4660_v4 }
 0x1cb   : > { %v1502_v62 = vpop.f32.mrb[0].mxu1  ;;  %v1003_v30 = vpop.f32.mrb[0].mxu0 }
 0x1cc   : > { %v3566_v40 = vadd.f32 %v1502_v62, %v423_v26  ;;  %v3564_v52 = vadd.f32 %v1003_v30, %v423_v26  ;;  %v1005_v54 = vpop.f32.mrb[1].mxu0  ;;  %v3185_v7 = vpop.f32.mrb[1].mxu1 }
 0x1cd   : > { %v3565_v55 = vadd.f32 %v1005_v54, %v423_v26 }
 0x1ce   : > { %v1522_v56 = vmul.f32 %v3564_v52, %v4049_v29  ;;  %v1524_v60 = vmul.f32 %v3566_v40, %v4053_v39 }
 0x1cf   : > { %v1523_v59 = vmul.f32 %v3565_v55, %v4051_v31 }
 0x1d0   : > { %v1529_v12 = vmul.f32 %v3564_v52, %v1522_v56  ;;  %v1531_v27 = vmul.f32 %v3566_v40, %v1524_v60 }
 0x1d1   : > { %v1530_v13 = vmul.f32 %v3565_v55, %v1523_v59  ;;  %v1525_v21 = vadd.f32 %v1523_v59, %v1522_v56 }
 0x1d3   : > { %v1526_v24 = vadd.f32 %v1525_v21, %v1524_v60  ;;  %v1532_v28 = vadd.f32 %v1530_v13, %v1529_v12 }
 0x1d5   : > { %1527 = vadd.xlane.f32.xlu1 %v1526_v24  ;;  %v1533_v32 = vadd.f32 %v1532_v28, %v1531_v27 }
 0x1d7   : > { %1534 = vadd.xlane.f32.xlu0 %v1533_v32 }
 0x262   : > { %v1528_v33 = vpop.xlane.xlu1 %1527 }
 0x263   : > { %v1536_v45 = vmul.f32 0.00390625, %v1528_v33 }
 0x264   : > { %v1535_v46 = vpop.xlane.xlu0 %1534 }
 0x265   : > { %v1537_v47 = vmul.f32 0.00390625, %v1535_v46  ;;  %v1538_v53 = vmul.f32 %v1536_v45, %v1536_v45  ;;  %v1541_v2 = vsub.f32 %v3564_v52, %v1536_v45  ;;  %v1542_v35 = vsub.f32 %v3565_v55, %v1536_v45 }
 0x266   : > { %v1543_v36 = vsub.f32 %v3566_v40, %v1536_v45  ;;  %v1690_v52 = vsel %vm1688_vm11, %v1654_v15, 0 }
 0x267   : > { %v1539_v57 = vsub.f32 %v1537_v47, %v1538_v53  ;;  %v4143_v12 = vand.u32 4294901760, %v1690_v52 }
 0x269   : > { %v1540_v58 = vmax.f32 %v1539_v57, 0.0  ;;  %v4169_v47 = vsub.f32 %v1690_v52, %v4143_v12 }
 0x26b   : > { %v1544_v63 = vadd.f32 1e-05, %v1540_v58 }
 0x26d   : > { %3634 = vrsqrt.f32 %v1544_v63 }
 0x277   : > { %v3635_v38 = vpop.eup %3634 }
 0x278   : > { %v1546_v41 = vmul.f32 %v3635_v38, %v1541_v2  ;;  %v1547_v42 = vmul.f32 %v3635_v38, %v1542_v35  ;;  %v1548_v43 = vmul.f32 %v3635_v38, %v1543_v36 }
 0x27a   : > { %v1549_v37 = vmax.f32 %v1546_v41, 0.0  ;;  %v1550_v20 = vmax.f32 %v1547_v42, 0.0  ;;  %v1551_v44 = vmax.f32 %v1548_v43, 0.0 }
 0x27c   : > { %v4059_v61 = vmul.f32 %v1549_v37, %v4049_v29  ;;  %v4062_v48 = vmul.f32 %v1550_v20, %v4051_v31  ;;  %v4069_v49 = vmul.f32 %v1551_v44, %v4053_v39 }
 0x27e   : > { %1557 = vrot.lane.b32.xlu0 %v4062_v48, %s3648_s29  ;;  %1555 = vrot.lane.b32.xlu1 %v4059_v61, %s3648_s29  ;;  %v1710_v59 = vand.u32 4294901760, %v4059_v61  ;;  %v1708_v60 = vand.u32 4294901760, %v4062_v48  ;;  %v2378_v21 = vand.u32 4294901760, %v4069_v49 }
 0x280   : > { %v4159_v32 = vsub.f32 %v4059_v61, %v1710_v59  ;;  %v4164_v33 = vsub.f32 %v4062_v48, %v1708_v60  ;;  %v4178_v63 = vsub.f32 %v4069_v49, %v2378_v21 }
 0x282   : > { %1559 = vrot.lane.b32.xlu0 %v4069_v49, %s3648_s29  ;;  %1567 = vrot.lane.b32.xlu1 %v4059_v61, %s3647_s28  ;;  %v4657_v20 = vand.u32 4294901760, %v4164_v33  ;;  %v4664_v44 = vand.u32 4294901760, %v4159_v32 }
 0x286   : > { %1579 = vrot.lane.b32.xlu0 %v4059_v61, %s3649_s30  ;;  %1569 = vrot.lane.b32.xlu1 %v4062_v48, %s3647_s28 }
 0x28a   : > { %1591 = vrot.lane.b32.xlu0 %v4059_v61, %s3646_s27  ;;  %1571 = vrot.lane.b32.xlu1 %v4069_v49, %s3647_s28 }
 0x28e   : > { %1583 = vrot.lane.b32.xlu0 %v4069_v49, %s3649_s30  ;;  %1581 = vrot.lane.b32.xlu1 %v4062_v48, %s3649_s30 }
 0x292   : > { %1608 = vrot.lane.b32.xlu0 %v4062_v48, %s3651_s7  ;;  %1593 = vrot.lane.b32.xlu1 %v4062_v48, %s3646_s27 }
 0x296   : > { %1606 = vrot.lane.b32.xlu0 %v4059_v61, %s3651_s7  ;;  %1595 = vrot.lane.b32.xlu1 %v4069_v49, %s3646_s27 }
 0x29a   : > { %1622 = vrot.lane.b32.xlu0 %v4069_v49, %s3653_s9  ;;  %1610 = vrot.lane.b32.xlu1 %v4069_v49, %s3651_s7 }
 0x29e   : > { %1634 = vrot.lane.b32.xlu0 %v4069_v49, %s3652_s8  ;;  %1620 = vrot.lane.b32.xlu1 %v4062_v48, %s3653_s9 }
 0x2a2   : > { %1630 = vrot.lane.b32.xlu0 %v4059_v61, %s3652_s8  ;;  %1632 = vrot.lane.b32.xlu1 %v4062_v48, %s3652_s8 }
 0x2a6   : > { %1646 = vrot.lane.b32.xlu0 %v4069_v49, %s3654_s10  ;;  %1618 = vrot.lane.b32.xlu1 %v4059_v61, %s3653_s9 }
 0x2aa   : > { %1685 = vperm.xlu0 %3632, %v1682_v51   ;;  %1644 = vrot.lane.b32.xlu1 %v4062_v48, %s3654_s10 }
 0x2ae   : > { %1642 = vrot.lane.b32.xlu1 %v4059_v61, %s3654_s10 }
 0x2f0   : > { %v1558_v0 = vpop.permute.xlu0 %1557  ;;  %v1556_v5 = vpop.permute.xlu1 %1555 }
 0x2f1   : > { %v1562_v11 = vsel %vm266_vm3, %v1556_v5, %v1558_v0 }
 0x2f2   : > { %v1692_v19 = vand.u32 4294901760, %v1562_v11 }
 0x2f4   : > { %v1560_v9 = vpop.permute.xlu0 %1559  ;;  %v1568_v10 = vpop.permute.xlu1 %1567  ;;  %v4171_v53 = vsub.f32 %v1562_v11, %v1692_v19 }
 0x2f5   : > { %v1563_v17 = vsel %vm266_vm3, %v1560_v9, %v1556_v5  ;;  %v1561_v18 = vsel %vm266_vm3, %v1558_v0, %v1560_v9  ;;  %v4209_v5 = vand.u32 4294901760, %v4169_v47 }
 0x2f6   : > { %v1694_v26 = vand.u32 4294901760, %v1563_v17  ;;  %v2366_v30 = vand.u32 4294901760, %v1561_v18  ;;  %v4658_v9 = vand.u32 4294901760, %v4171_v53 }
 0x2f7   : > { %4699 = vst [vmem:[#allocation8_spill] sm:$0xff] %v4209_v5 }
 0x2f8   : > { %v1580_v34 = vpop.permute.xlu0 %1579  ;;  %v1570_v6 = vpop.permute.xlu1 %1569  ;;  %v4173_v57 = vsub.f32 %v1563_v17, %v1694_v26  ;;  %v4180_v2 = vsub.f32 %v1561_v18, %v2366_v30 }
 0x2f9   : > { %v1574_v16 = vsel %vm279_vm2, %v1568_v10, %v1570_v6 }
 0x2fa   : > { %v1696_v14 = vand.u32 4294901760, %v1574_v16 }
 0x2fc   : > { %v1592_v22 = vpop.permute.xlu0 %1591  ;;  %v1572_v50 = vpop.permute.xlu1 %1571  ;;  %v4126_v1 = vpack.c.bf16 %v1696_v14, %v1692_v19  ;;  %v4182_v35 = vsub.f32 %v1574_v16, %v1696_v14 }
 0x2fd   : > { %v1573_v23 = vsel %vm279_vm2, %v1570_v6, %v1572_v50  ;;  %v1575_v25 = vsel %vm279_vm2, %v1572_v50, %v1568_v10  ;;  %v4659_v10 = vand.u32 4294901760, %v4173_v57  ;;  %v4663_v6 = vand.u32 4294901760, %v4180_v2 }
 0x2fe   : > { %v1698_v62 = vand.u32 4294901760, %v1575_v25  ;;  %3397 = vmatprep.subr.bf16.mxu0 %v4126_v1  ;;  %v2369_v40 = vand.u32 4294901760, %v1573_v23  ;;  %v4662_v16 = vand.u32 4294901760, %v4182_v35 }
 0x300   : > { %v4136_v54 = vpack.c.bf16 %v1698_v62, %v1694_v26  ;;  %v1584_v7 = vpop.permute.xlu0 %1583  ;;  %v1582_v55 = vpop.permute.xlu1 %1581  ;;  %v4138_v56 = vpack.c.bf16 %v2369_v40, %v2366_v30  ;;  %v4204_v49 = vsub.f32 %v1575_v25, %v1698_v62  ;;  %v1778_v62 = vsub.f32 %v4169_v47, %v4209_v5 }
 0x301   : > { %v4147_v13 = vsel %vm301_vm4, %v1580_v34, %v1582_v55  ;;  %v1587_v58 = vsel %vm301_vm4, %v1584_v7, %v1580_v34  ;;  %v4186_v36 = vsel %vm301_vm4, %v1582_v55, %v1584_v7  ;;  %v4667_v30 = vand.u32 4294901760, %v4178_v63 }
 0x302   : > { %3399 = vmatpush1.bf16.msra.mxu0 %v4136_v54  ;;  %3494 = vmatpush3.bf16.msra.mxu1 %v4138_v56  ;;  %v1700_v45 = vand.u32 4294901760, %v4147_v13  ;;  %v1702_v51 = vand.u32 4294901760, %v1587_v58  ;;  %v2372_v11 = vand.u32 4294901760, %v4186_v36  ;;  %v4666_v26 = vand.u32 4294901760, %v4204_v49 }
 0x303   : > { %3495 = vmatprep.subr.bf16.mxu1 %v4669_v3  ;;  %v1789_v55 = vsub.f32 %v4171_v53, %v4658_v9 }
 0x304   : > { %v1609_v24 = vpop.permute.xlu0 %1608  ;;  %v1594_v27 = vpop.permute.xlu1 %1593  ;;  %v4275_v4 = vsub.f32 %v4204_v49, %v4666_v26  ;;  %v4293_v26 = vand.u32 4294901760, %v1778_v62 }
 0x305   : > { %v4154_v28 = vsel %vm314_vm1, %v1592_v22, %v1594_v27 }
 0x306   : > { %v1704_v46 = vand.u32 4294901760, %v4154_v28 }
 0x308   : > { %v1607_v38 = vpop.permute.xlu0 %1606  ;;  %v1596_v41 = vpop.permute.xlu1 %1595  ;;  %v4192_v42 = vpack.c.bf16 %v1704_v46, %v1700_v45 }
 0x309   : > { %v4196_v43 = vsel %vm314_vm1, %v1594_v27, %v1596_v41  ;;  %v4200_v37 = vsel %vm314_vm1, %v1596_v41, %v1592_v22  ;;  %v1613_v19 = vsel %vm339_vm5, %v1607_v38, %v1609_v24  ;;  %v4225_v22 = vsub.f32 %v1573_v23, %v2369_v40 }
 0x30a   : > { %4698 = vst [vmem:[#allocation7_spill] sm:$0xff] %v4192_v42  ;;  %v4665_v0 = vand.u32 4294901760, %v4200_v37  ;;  %3401 = vmatprep.subr.bf16.mxu0 %v4192_v42  ;;  %v2375_v34 = vand.u32 4294901760, %v4196_v43  ;;  %v4242_v23 = vsub.f32 %v4164_v33, %v4657_v20  ;;  %v1714_v40 = vand.u32 4294901760, %v1613_v19 }
 0x30b   : > { %v1801_v41 = vsub.f32 %v4182_v35, %v4662_v16  ;;  %v4668_v20 = vand.u32 4294901760, %v4225_v22  ;;  %v4277_v16 = vsub.f32 %v1587_v58, %v1702_v51  ;;  %v4324_v58 = vsub.f32 %v4186_v36, %v2372_v11 }
 0x30c   : > { %v4221_v14 = vpack.c.bf16 %v4665_v0, %v1702_v51  ;;  %v4223_v17 = vpop.permute.xlu0 %1622  ;;  %v1611_v18 = vpop.permute.xlu1 %1610  ;;  %v4227_v50 = vpack.c.bf16 %v2375_v34, %v2372_v11  ;;  %v1790_v0 = vand.u32 4294901760, %v1789_v55 }
 0x30d   : > { %v1612_v15 = vsel %vm339_vm5, %v1609_v24, %v1611_v18  ;;  %v4233_v25 = vsel %vm339_vm5, %v1611_v18, %v1607_v38  ;;  %v4253_v24 = vsub.f32 %v4173_v57, %v4659_v10  ;;  %v4262_v18 = vsub.f32 %v4180_v2, %v4663_v6 }
 0x30e   : > { %4700 = vst [vmem:[#allocation9_spill] sm:$0xff] %v4221_v14  ;;  %4701 = vst [vmem:[#allocation10_spill] sm:$0xff] %v4227_v50  ;;  %3403 = vmatpush1.bf16.msra.mxu0 %v4221_v14  ;;  %v1712_v52 = vand.u32 4294901760, %v1612_v15  ;;  %v2381_v7 = vand.u32 4294901760, %v4233_v25  ;;  %3497 = vmatpush3.bf16.msra.mxu1 %v4227_v50  ;;  %v4270_v10 = vsub.f32 %v4159_v32, %v4664_v44  ;;  %v1802_v62 = vand.u32 4294901760, %v1801_v41 }
 0x30f   : > { %3498 = vmatprep.subr.bf16.mxu1 %v4669_v3  ;;  %v4290_v44 = vpack.c.bf16 %v1714_v40, %v1710_v59  ;;  %v1796_v48 = vand.u32 4294901760, %v4253_v24  ;;  %v4311_v24 = vsub.f32 %v4225_v22, %v4668_v20  ;;  %v4326_v20 = vsub.f32 %v1613_v19, %v1714_v40 }
 0x310   : > { %v1635_v27 = vpop.permute.xlu0 %1634  ;;  %v1621_v38 = vpop.permute.xlu1 %1620  ;;  %v4265_v9 = vpack.c.bf16 %v2381_v7, %v2378_v21  ;;  %v4281_v6 = vpack.c.bf16 %v1712_v52, %v1708_v60  ;;  %v4286_v21 = vsub.f32 %v4178_v63, %v4667_v30  ;;  %v4300_v60 = vsub.f32 %v4147_v13, %v1700_v45 }
 0x311   : > { %4704 = vst [vmem:[#allocation13_spill] sm:$0xff] %v4290_v44  ;;  %v1624_v61 = vsel %vm361_vm8, %v1621_v38, %v4223_v17  ;;  %v4316_v13 = vsub.f32 %v4154_v28, %v1704_v46  ;;  %v1808_v30 = vand.u32 4294901760, %v4275_v4  ;;  %v4337_v4 = vsub.f32 %v4196_v43, %v2375_v34 }
 0x312   : > { %4702 = vst [vmem:[#allocation11_spill] sm:$0xff] %v4265_v9  ;;  %4703 = vst [vmem:[#allocation12_spill] sm:$0xff] %v4281_v6  ;;  %3500 = vmatpush3.bf16.msra.mxu1 %v4265_v9  ;;  %3405 = vmatprep.subr.bf16.mxu0 %v4281_v6  ;;  %v1716_v46 = vand.u32 4294901760, %v1624_v61  ;;  %v3412_v19 = vpack.c.bf16 %v1802_v62, %v1790_v0  ;;  %v4350_v43 = vsub.f32 %v1612_v15, %v1712_v52 }
 0x313   : > { %3501 = vmatprep.subr.bf16.mxu1 %v4669_v3  ;;  %3407 = vmatpush1.bf16.msra.mxu0 %v4290_v44  ;;  %v4705_v3 = vand.u32 4294901760, %v4200_v37  ;;  %v4708_v40 = vand.u32 4294901760, %v4277_v16  ;;  %v4712_v9 = vand.u32 4294901760, %v4326_v20 }
 0x314   : > { %v1631_v59 = vpop.permute.xlu0 %1630  ;;  %v1633_v51 = vpop.permute.xlu1 %1632 }
 0x315   : > { %v1636_v45 = vsel %vm374_vm7, %v1633_v51, %v1635_v27  ;;  %v4331_v28 = vsub.f32 %v4200_v37, %v4705_v3  ;;  %v1637_v39 = vsel %vm374_vm7, %v1631_v59, %v1633_v51  ;;  %v1638_v36 = vsel %vm374_vm7, %v1635_v27, %v1631_v59 }
 0x316   : > { %v1720_v55 = vand.u32 4294901760, %v1636_v45  ;;  %v1722_v34 = vand.u32 4294901760, %v1637_v39  ;;  %v2387_v59 = vand.u32 4294901760, %v1638_v36  ;;  %v1819_v27 = vsub.f32 %v4277_v16, %v4708_v40 }
 0x317   : > { %v3414_v40 = vpack.c.bf16 %v1808_v30, %v1796_v48  ;;  %v4382_v44 = vsub.f32 %v4326_v20, %v4712_v9  ;;  %v4713_v6 = vand.u32 4294901760, %v4331_v28  ;;  %v4397_v9 = vsub.f32 %v1624_v61, %v1716_v46 }
 0x318   : > { %v1619_v11 = vpop.permute.xlu1 %1618  ;;  %v4347_v51 = vpack.c.bf16 %v1720_v55, %v1716_v46  ;;  %v1647_v31 = vpop.permute.xlu0 %1646  ;;  %v4717_v46 = vand.u32 4294901760, %v4350_v43 }
 0x319   : > { %v1625_v3 = vsel %vm361_vm8, %v1619_v11, %v1621_v38  ;;  %v1626_v37 = vsel %vm361_vm8, %v4223_v17, %v1619_v11  ;;  %v2461_v38 = vand.u32 4294901760, %v4311_v24  ;;  %v4358_v11 = vsub.f32 %v4233_v25, %v2381_v7 }
 0x31a   : > { %4706 = vst [vmem:[#allocation14_spill] sm:$0xff] %v4347_v51  ;;  %v1718_v41 = vand.u32 4294901760, %v1625_v3  ;;  %v2384_v62 = vand.u32 4294901760, %v1626_v37  ;;  %3409 = vmatprep.subr.bf16.mxu0 %v4347_v51  ;;  %v4710_v24 = vand.u32 4294901760, %v4316_v13  ;;  %v4711_v25 = vand.u32 4294901760, %v4324_v58 }
 0x31b   : > { %v4376_v51 = vsub.f32 %v1636_v45, %v1720_v55  ;;  %v4715_v45 = vand.u32 4294901760, %v4337_v4  ;;  %v1860_v48 = vand.u32 4294901760, %v4397_v9 }
 0x31c   : > { %v4360_v15 = vpack.c.bf16 %v1722_v34, %v1718_v41  ;;  %v1645_v52 = vpop.permute.xlu1 %1644  ;;  %v4365_v0 = vpack.c.bf16 %v2387_v59, %v2384_v62  ;;  %v1825_v17 = vsub.f32 %v4316_v13, %v4710_v24  ;;  %v2467_v7 = vsub.f32 %v4324_v58, %v4711_v25 }
 0x31d   : > { %v1648_v29 = vsel %vm396_vm9, %v1645_v52, %v1647_v31  ;;  %v1831_v24 = vsub.f32 %v4331_v28, %v4713_v6  ;;  %v4714_v25 = vand.u32 4294901760, %v4300_v60  ;;  %v2474_v30 = vsub.f32 %v4337_v4, %v4715_v45 }
 0x31e   : > { %4707 = vst [vmem:[#allocation15_spill] sm:$0xff] %v4360_v15  ;;  %4709 = vst [vmem:[#allocation16_spill] sm:$0xff] %v4365_v0  ;;  %3411 = vmatpush1.bf16.msra.mxu0 %v4360_v15  ;;  %v4387_v50 = vand.u32 4294901760, %v1648_v29  ;;  %3503 = vmatpush3.bf16.msra.mxu1 %v4365_v0  ;;  %v4399_v5 = vsub.f32 %v1625_v3, %v1718_v41  ;;  %v4716_v6 = vmov 0.0   ;;  %v4402_v14 = vsub.f32 %v1626_v37, %v2384_v62 }
 0x31f   : > { %v1813_v55 = vsub.f32 %v4300_v60, %v4714_v25  ;;  %3202 = vmatprep.subr.mxu1 %v4716_v6  ;;  %v1826_v45 = vand.u32 4294901760, %v1825_v17  ;;  %v1849_v3 = vsub.f32 %v4350_v43, %v4717_v46  ;;  %v1832_v37 = vand.u32 4294901760, %v1831_v24 }
 0x320   : > { %v1643_v15 = vpop.permute.xlu1 %1642  ;;  %1725 = vmatprep.subr.mxu0 %v4387_v50  ;;  %v4417_v62 = vsub.f32 %v1638_v36, %v2387_v59  ;;  %v1866_v42 = vand.u32 4294901760, %v4399_v5  ;;  %v1820_v46 = vand.u32 4294901760, %v1819_v27  ;;  %v2468_v24 = vand.u32 4294901760, %v2467_v7 }
 0x321   : > { %v1649_v0 = vsel %vm396_vm9, %v1643_v15, %v1645_v52  ;;  %v1650_v25 = vsel %vm396_vm9, %v1647_v31, %v1643_v15  ;;  %v4419_v52 = vsub.f32 %v1637_v39, %v1722_v34  ;;  %v1814_v8 = vand.u32 4294901760, %v1813_v55 }
 0x322   : > { %v4410_v61 = vand.u32 4294901760, %v1649_v0  ;;  %v4412_v41 = vand.u32 4294901760, %v1650_v25  ;;  %v2475_v31 = vand.u32 4294901760, %v2474_v30  ;;  %v4718_v15 = vand.u32 4294901760, %v4358_v11 }
 0x323   : > { %v4719_v39 = vmov 0.0|0.0   ;;  %v4720_v34 = vand.u32 4294901760, %v4262_v18  ;;  %v4433_v55 = vsub.f32 %v1648_v29, %v4387_v50  ;;  %v3416_v30 = vpack.c.bf16 %v1826_v45, %v1814_v8 }
 0x324   : > { %v2488_v17 = vsub.f32 %v4358_v11, %v4718_v15  ;;  %1727 = vmatpush1.msra.mxu0 %v4410_v61  ;;  %3203 = vmatpush3.msra.mxu1 %v4412_v41  ;;  %v1850_v15 = vand.u32 4294901760, %v1849_v3  ;;  %v4721_v27 = vand.u32 4294901760, %v4376_v51  ;;  %v4694_v36 = vand.u32 4294901760, %v4417_v62 }
 0x325   : > { %3413 = vmatprep.subr.bf16.mxu0 %v3412_v19  ;;  %3504 = vmatprep.subr.bf16.mxu1 %v4719_v39  ;;  %v3505_v59 = vpack.c.bf16 %v2461_v38, %v4720_v34  ;;  %v1856_v19 = vand.u32 4294901760, %v4382_v44  ;;  %v1878_v18 = vand.u32 4294901760, %v4419_v52  ;;  %v3418_v29 = vpack.c.bf16 %v1832_v37, %v1820_v46 }
 0x326   : > { %1780 = vmatmul.mubr.f32.vlgmr.msra.gmra.mrb[2].mxu0 %v4293_v26  ;;  %3205 = vmatmul.mubr.f32.vlgmr.msra.gmra.mrb[2].mxu1 %v4293_v26  ;;  %v1873_v7 = vsub.f32 %v4376_v51, %v4721_v27  ;;  %v2489_v38 = vand.u32 4294901760, %v2488_v17  ;;  %v1867_v26 = vsub.f32 %v4399_v5, %v1866_v42  ;;  %v3508_v45 = vpack.c.bf16 %v2475_v31, %v2468_v24 }
 0x327   : > { %3415 = vmatpush1.bf16.msra.mxu0 %v3414_v40  ;;  %3506 = vmatpush3.bf16.msra.mxu1 %v3505_v59  ;;  %v1861_v44 = vsub.f32 %v4397_v9, %v1860_v48  ;;  %v4722_v3 = vand.u32 4294901760, %v4402_v14  ;;  %v4454_v40 = vsub.f32 %v1649_v0, %v4410_v61  ;;  %v4457_v37 = vsub.f32 %v1650_v25, %v4412_v41 }
 0x328   : > { %3417 = vmatprep.subr.bf16.mxu0 %v3416_v30  ;;  %3507 = vmatprep.subr.bf16.mxu1 %v4719_v39  ;;  %v1844_v17 = vand.u32 4294901760, %v4270_v10  ;;  %v4723_v31 = vand.u32 4294901760, %v4242_v23  ;;  %v2482_v24 = vand.u32 4294901760, %v4286_v21  ;;  %v1874_v34 = vand.u32 4294901760, %v1873_v7 }
 0x329   : > { %v2495_v8 = vsub.f32 %v4402_v14, %v4722_v3  ;;  %1940 = vmatprep.mubr.f32.mxu0 %v4716_v6  ;;  %3225 = vmatprep.mubr.msk.f32.mxu1 %vm3656_vm0, %v4716_v6  ;;  %v1884_v59 = vand.u32 4294901760, %v4433_v55  ;;  %v2502_v0 = vsub.f32 %v4417_v62, %v4694_v36  ;;  %v1879_v10 = vsub.f32 %v4419_v52, %v1878_v18 }
 0x32a   : > { %v3420_v46 = vpack.c.bf16 %v1850_v15, %v4723_v31  ;;  %v3422_v23 = vpack.c.bf16 %v1856_v19, %v1844_v17  ;;  %v3511_v25 = vpack.c.bf16 %v2489_v38, %v2482_v24  ;;  %v1862_v30 = vand.u32 4294901760, %v1861_v44 }
 0x32b   : > { %3419 = vmatpush1.bf16.msra.mxu0 %v3418_v29  ;;  %3509 = vmatpush3.bf16.msra.mxu1 %v3508_v45  ;;  %v1868_v21 = vand.u32 4294901760, %v1867_v26  ;;  %v2496_v15 = vand.u32 4294901760, %v2495_v8  ;;  %v1890_v27 = vand.u32 4294901760, %v4454_v40  ;;  %v2508_v7 = vand.u32 4294901760, %v4457_v37 }
 0x32c   : > { %3421 = vmatprep.subr.bf16.mxu0 %v3420_v46  ;;  %3510 = vmatprep.subr.bf16.mxu1 %v4719_v39  ;;  %v3424_v3 = vpack.c.bf16 %v1874_v34, %v1862_v30  ;;  %v1885_v31 = vsub.f32 %v4433_v55, %v1884_v59  ;;  %v2503_v36 = vand.u32 4294901760, %v2502_v0  ;;  %v1880_v29 = vand.u32 4294901760, %v1879_v10 }
 0x32d   : > { %v1891_v19 = vsub.f32 %v4454_v40, %v1890_v27  ;;  %v2509_v38 = vsub.f32 %v4457_v37, %v2508_v7  ;;  %v3428_v46 = vpack.c.bf16 %v4182_v35, %v4171_v53  ;;  %v3430_v24 = vpack.c.bf16 %v4204_v49, %v4173_v57 }
 0x32e   : > { %v3426_v26 = vpack.c.bf16 %v1880_v29, %v1868_v21  ;;  %v3514_v45 = vpack.c.bf16 %v2503_v36, %v2496_v15  ;;  %v1886_v44 = vand.u32 4294901760, %v1885_v31  ;;  %v3517_v34 = vpack.c.bf16 %v4225_v22, %v4180_v2  ;;  %v4724_v31 = vld [vmem:[#allocation7_spill] sm:$0xff]  ;;  %v4725_v29 = vld [vmem:[#allocation9_spill] sm:$0xff] }
 0x32f   : > { %3423 = vmatpush1.bf16.msra.mxu0 %v3422_v23  ;;  %3512 = vmatpush3.bf16.msra.mxu1 %v3511_v25  ;;  %v1892_v8 = vand.u32 4294901760, %v1891_v19  ;;  %v2510_v17 = vand.u32 4294901760, %v2509_v38  ;;  %v3432_v36 = vpack.c.bf16 %v4316_v13, %v4300_v60  ;;  %v3434_v0 = vpack.c.bf16 %v4331_v28, %v4277_v16  ;;  %v4726_v19 = vld [vmem:[#allocation10_spill] sm:$0xff]  ;;  %v4727_v38 = vld [vmem:[#allocation12_spill] sm:$0xff] }
 0x330   : > { %3425 = vmatprep.subr.bf16.mxu0 %v3424_v3  ;;  %3513 = vmatprep.subr.bf16.mxu1 %v4719_v39  ;;  %v3520_v10 = vpack.c.bf16 %v4337_v4, %v4324_v58  ;;  %v3436_v23 = vpack.c.bf16 %v4350_v43, %v4164_v33  ;;  %v3438_v25 = vpack.c.bf16 %v4326_v20, %v4159_v32 }
 0x331   : > { %v3523_v30 = vpack.c.bf16 %v4358_v11, %v4178_v63  ;;  %v3440_v21 = vpack.c.bf16 %v4376_v51, %v4397_v9  ;;  %v3442_v15 = vpack.c.bf16 %v4419_v52, %v4399_v5  ;;  %v3526_v3 = vpack.c.bf16 %v4417_v62, %v4402_v14  ;;  %v4755_v9 = vld [vmem:[#allocation4_spill] sm:$0xff]  ;;  %v4757_v52 = vld [vmem:[#allocation6_spill] sm:$0xff] }
 0x333   : > { %3427 = vmatpush1.bf16.msra.mxu0 %v3426_v26  ;;  %3515 = vmatpush3.bf16.msra.mxu1 %v3514_v45  ;;  %v4729_v26 = vld [vmem:[#allocation11_spill] sm:$0xff]  ;;  %v4730_v45 = vld [vmem:[#allocation14_spill] sm:$0xff] }
 0x334   : > { %1887 = vmatprep.subr.mxu0 %v1886_v44  ;;  %3223 = vmatprep.subr.mxu1 %v4716_v6  ;;  %v4731_v44 = vld [vmem:[#allocation15_spill] sm:$0xff] }
 0x337   : > { %1893 = vmatpush1.msra.mxu0 %v1892_v8  ;;  %3224 = vmatpush3.msra.mxu1 %v2510_v17  ;;  %v4732_v8 = vld [vmem:[#allocation16_spill] sm:$0xff]  ;;  %v4733_v17 = vand.u32 4294901760, %v4171_v53 }
 0x338   : > { %3429 = vmatprep.subr.bf16.mxu0 %v3428_v46  ;;  %3516 = vmatprep.subr.bf16.mxu1 %v4719_v39  ;;  %v4734_v46 = vand.u32 4294901760, %v4182_v35  ;;  %v4740_v35 = vand.u32 4294901760, %v4300_v60  ;;  %v4746_v60 = vand.u32 4294901760, %v4164_v33  ;;  %v4752_v33 = vand.u32 4294901760, %v4376_v51 }
 0x339   : > { %1942 = vmatmul.mubr.f32.vlgmr.msra.gmra.mrb[2].mxu0 %v4143_v12  ;;  %3226 = vmatmul.mubr.f32.vlgmr.msra.gmra.mrb[2].mxu1 %v4143_v12 }
 0x33a   : > { %3431 = vmatpush1.bf16.msra.mxu0 %v3430_v24  ;;  %3518 = vmatpush3.bf16.msra.mxu1 %v3517_v34  ;;  %v3460_v24 = vpack.c.bf16 %v4734_v46, %v4733_v17  ;;  %v4735_v34 = vand.u32 4294901760, %v4173_v57  ;;  %v4742_v57 = vand.u32 4294901760, %v4277_v16  ;;  %v4748_v16 = vand.u32 4294901760, %v4159_v32 }
 0x33b   : > { %3433 = vmatprep.subr.bf16.mxu0 %v3432_v36  ;;  %3519 = vmatprep.subr.bf16.mxu1 %v4719_v39  ;;  %v4736_v36 = vand.u32 4294901760, %v4204_v49  ;;  %v4751_v46 = vand.u32 4294901760, %v4358_v11  ;;  %v3474_v32 = vpack.c.bf16 %v1878_v18, %v1866_v42 }
 0x33c   : > { %2048 = vmatprep.mubr.f32.mxu0 %v4716_v6  ;;  %3246 = vmatprep.mubr.msk.f32.mxu1 %vm3656_vm0, %v4716_v6 }
 0x33e   : > { %3435 = vmatpush1.bf16.msra.mxu0 %v3434_v0  ;;  %3521 = vmatpush3.bf16.msra.mxu1 %v3520_v10  ;;  %v3462_v0 = vpack.c.bf16 %v4736_v36, %v4735_v34  ;;  %v4737_v10 = vand.u32 4294901760, %v4180_v2  ;;  %v4743_v2 = vand.u32 4294901760, %v4331_v28 }
 0x33f   : > { %3437 = vmatprep.subr.bf16.mxu0 %v3436_v23  ;;  %3522 = vmatprep.subr.bf16.mxu1 %v4719_v39  ;;  %v4738_v23 = vand.u32 4294901760, %v4225_v22  ;;  %v4744_v22 = vand.u32 4294901760, %v4324_v58  ;;  %v4749_v58 = vand.u32 4294901760, %v4326_v20  ;;  %v4754_v20 = vand.u32 4294901760, %v4417_v62  ;;  %v4756_v62 = vld [vmem:[#allocation5_spill] sm:$0xff] }
 0x340   : > { %v3466_v49 = vpack.c.bf16 %v4743_v2, %v4742_v57 }
 0x341   : > { %v3541_v53 = vpack.c.bf16 %v4738_v23, %v4737_v10  ;;  %v3470_v28 = vpack.c.bf16 %v4749_v58, %v4748_v16 }
 0x342   : > { %3439 = vmatpush1.bf16.msra.mxu0 %v3438_v25  ;;  %3524 = vmatpush3.bf16.msra.mxu1 %v3523_v30  ;;  %v4739_v25 = vld [vmem:[#allocation8_spill] sm:$0xff]  ;;  %v4741_v30 = vand.u32 4294901760, %v4316_v13  ;;  %v4747_v13 = vand.u32 4294901760, %v4350_v43  ;;  %v3472_v43 = vpack.c.bf16 %v4752_v33, %v1860_v48 }
 0x343   : > { %3441 = vmatprep.subr.bf16.mxu0 %v3440_v21  ;;  %3525 = vmatprep.subr.bf16.mxu1 %v4719_v39 }
 0x344   : > { %v3464_v21 = vpack.c.bf16 %v4741_v30, %v4740_v35  ;;  %v3468_v17 = vpack.c.bf16 %v4747_v13, %v4746_v60 }
 0x346   : > { %3443 = vmatpush1.bf16.msra.mxu0 %v3442_v15  ;;  %3527 = vmatpush3.bf16.msra.mxu1 %v3526_v3  ;;  %v4745_v15 = vand.u32 4294901760, %v4337_v4  ;;  %v4750_v4 = vand.u32 4294901760, %v4178_v63  ;;  %v4753_v63 = vand.u32 4294901760, %v4402_v14 }
 0x347   : > { %1998 = vmatprep.subr.mxu0 %v4433_v55  ;;  %3244 = vmatprep.subr.mxu1 %v4716_v6 }
 0x348   : > { %v3544_v3 = vpack.c.bf16 %v4745_v15, %v4744_v22  ;;  %v3550_v11 = vpack.c.bf16 %v4754_v20, %v4753_v63 }
 0x34a   : > { %2001 = vmatpush1.msra.mxu0 %v4454_v40  ;;  %3245 = vmatpush3.msra.mxu1 %v4457_v37 }
 0x34b   : > { %3445 = vmatprep.subr.bf16.mxu0 %v4126_v1  ;;  %3528 = vmatprep.subr.bf16.mxu1 %v4719_v39 }
 0x34c   : > { %2051 = vmatmul.mubr.f32.vlgmr.msra.gmra.mrb[2].mxu0 %v4169_v47  ;;  %3247 = vmatmul.mubr.f32.vlgmr.msra.gmra.mrb[2].mxu1 %v4169_v47  ;;  %v4728_v47 = vld [vmem:[#allocation13_spill] sm:$0xff] }
 0x34d   : > { %3447 = vmatpush1.bf16.msra.mxu0 %v4136_v54  ;;  %3530 = vmatpush3.bf16.msra.mxu1 %v4138_v56 }
 0x34e   : > { %3449 = vmatprep.subr.bf16.mxu0 %v4724_v31  ;;  %3531 = vmatprep.subr.bf16.mxu1 %v4719_v39 }
 0x34f   : > { %2139 = vmatprep.mubr.f32.mxu0 %v4716_v6  ;;  %3267 = vmatprep.mubr.msk.f32.mxu1 %vm3656_vm0, %v4716_v6 }
 0x351   : > { %3451 = vmatpush1.bf16.msra.mxu0 %v4725_v29  ;;  %3533 = vmatpush3.bf16.msra.mxu1 %v4726_v19 }
 0x352   : > { %3453 = vmatprep.subr.bf16.mxu0 %v4727_v38  ;;  %3534 = vmatprep.subr.bf16.mxu1 %v4719_v39 }
 0x355   : > { %3455 = vmatpush1.bf16.msra.mxu0 %v4728_v47  ;;  %3536 = vmatpush3.bf16.msra.mxu1 %v4729_v26 }
 0x356   : > { %3457 = vmatprep.subr.bf16.mxu0 %v4730_v45  ;;  %3537 = vmatprep.subr.bf16.mxu1 %v4719_v39 }
 0x359   : > { %3459 = vmatpush1.bf16.msra.mxu0 %v4731_v44  ;;  %3539 = vmatpush3.bf16.msra.mxu1 %v4732_v8 }
 0x35a   : > { %2090 = vmatprep.subr.mxu0 %v4387_v50  ;;  %3265 = vmatprep.subr.mxu1 %v4716_v6 }
 0x35d   : > { %2092 = vmatpush1.msra.mxu0 %v4410_v61  ;;  %3266 = vmatpush3.msra.mxu1 %v4412_v41 }
 0x35e   : > { %3461 = vmatprep.subr.bf16.mxu0 %v3460_v24  ;;  %3540 = vmatprep.subr.bf16.mxu1 %v4719_v39  ;;  %v3547_v24 = vpack.c.bf16 %v4751_v46, %v4750_v4 }
 0x35f   : > { %2143 = vmatmul.mubr.f32.vlgmr.msra.gmra.mrb[2].mxu0 %v4739_v25  ;;  %3268 = vmatmul.mubr.f32.vlgmr.msra.gmra.mrb[2].mxu1 %v4739_v25 }
 0x360   : > { %3463 = vmatpush1.bf16.msra.mxu0 %v3462_v0  ;;  %3542 = vmatpush3.bf16.msra.mxu1 %v3541_v53 }
 0x361   : > { %3465 = vmatprep.subr.bf16.mxu0 %v3464_v21  ;;  %3543 = vmatprep.subr.bf16.mxu1 %v4719_v39 }
 0x362   : > { %2267 = vmatprep.mubr.f32.mxu0 %v4716_v6  ;;  %3288 = vmatprep.mubr.msk.f32.mxu1 %vm3656_vm0, %v4716_v6 }
 0x364   : > { %3467 = vmatpush1.bf16.msra.mxu0 %v3466_v49  ;;  %3545 = vmatpush3.bf16.msra.mxu1 %v3544_v3 }
 0x365   : > { %3469 = vmatprep.subr.bf16.mxu0 %v3468_v17  ;;  %3546 = vmatprep.subr.bf16.mxu1 %v4719_v39 }
 0x368   : > { %3471 = vmatpush1.bf16.msra.mxu0 %v3470_v28  ;;  %3548 = vmatpush3.bf16.msra.mxu1 %v3547_v24 }
 0x369   : > { %3473 = vmatprep.subr.bf16.mxu0 %v3472_v43  ;;  %3549 = vmatprep.subr.bf16.mxu1 %v4719_v39 }
 0x36c   : > { %3475 = vmatpush1.bf16.msra.mxu0 %v3474_v32  ;;  %3551 = vmatpush3.bf16.msra.mxu1 %v3550_v11 }
 0x36d   : > { %2216 = vmatprep.subr.mxu0 %v1884_v59  ;;  %3286 = vmatprep.subr.mxu1 %v4716_v6 }
 0x370   : > { %2220 = vmatpush1.msra.mxu0 %v1890_v27  ;;  %3287 = vmatpush3.msra.mxu1 %v2508_v7 }
 0x371   : > { %3477 = vmatprep.subr.bf16.mxu0 %v4126_v1  ;;  %3552 = vmatprep.subr.bf16.mxu1 %v4719_v39  ;;  %v1686_v1 = vpop.permute.xlu0 %1685 }
 0x372   : > { %2269 = vmatmul.mubr.f32.vlgmr.msra.gmra.mrb[2].mxu0 %v4143_v12  ;;  %3289 = vmatmul.mubr.f32.vlgmr.msra.gmra.mrb[2].mxu1 %v4143_v12 }
 0x373   : > { %3479 = vmatpush1.bf16.msra.mxu0 %v4136_v54  ;;  %3554 = vmatpush3.bf16.msra.mxu1 %v4138_v56 }
 0x374   : > { %3481 = vmatprep.subr.bf16.mxu0 %v4724_v31  ;;  %3555 = vmatprep.subr.bf16.mxu1 %v4719_v39 }
 0x375   : > { %2357 = vmatprep.mubr.f32.mxu0 %v4716_v6  ;;  %3309 = vmatprep.mubr.msk.f32.mxu1 %vm3656_vm0, %v4716_v6 }
 0x377   : > { %3483 = vmatpush1.bf16.msra.mxu0 %v4725_v29  ;;  %3557 = vmatpush3.bf16.msra.mxu1 %v4726_v19 }
 0x378   : > { %3485 = vmatprep.subr.bf16.mxu0 %v4727_v38  ;;  %3558 = vmatprep.subr.bf16.mxu1 %v4719_v39 }
 0x37b   : > { %3487 = vmatpush1.bf16.msra.mxu0 %v4728_v47  ;;  %3560 = vmatpush3.bf16.msra.mxu1 %v4729_v26 }
 0x37c   : > { %3489 = vmatprep.subr.bf16.mxu0 %v4730_v45  ;;  %3561 = vmatprep.subr.bf16.mxu1 %v4719_v39 }
 0x37f   : > { %3491 = vmatpush1.bf16.msra.mxu0 %v4731_v44  ;;  %3563 = vmatpush3.bf16.msra.mxu1 %v4732_v8 }
 0x380   : > { %2308 = vmatprep.subr.mxu0 %v4387_v50  ;;  %3307 = vmatprep.subr.mxu1 %v4716_v6 }
 0x383   : > { %2310 = vmatpush1.msra.mxu0 %v4410_v61  ;;  %3308 = vmatpush3.msra.mxu1 %v4412_v41 }
 0x384   : > { %2359 = vmatmul.mubr.f32.vlgmr.msra.gmra.mrb[2].mxu0 %v4143_v12  ;;  %3310 = vmatmul.mubr.f32.vlgmr.msra.gmra.mrb[2].mxu1 %v4143_v12 }
 0x457   : > { %v2360_v54 = vpop.f32.mrb[2].mxu0  ;;  %v2911_v56 = vpop.f32.mrb[2].mxu1 }
 0x458   : > { %v3567_v42 = vadd.f32 %v2360_v54, %v1686_v1  ;;  %v3569_v5 = vadd.f32 %v2911_v56, %v1686_v1  ;;  %v2362_v14 = vpop.f32.mrb[3].mxu0  ;;  %v3311_v51 = vpop.f32.mrb[3].mxu1 }
 0x459   : > { %v3568_v48 = vadd.f32 %v2362_v14, %v1686_v1 }
 0x45a   : > { %v2915_v50 = vmul.f32 %v3567_v42, %v4755_v9  ;;  %v2917_v61 = vmul.f32 %v3569_v5, %v4757_v52 }
 0x45b   : > { %v2916_v6 = vmul.f32 %v3568_v48, %v4756_v62 }
 0x45c   : > { %v2922_v39 = vmul.f32 %v3567_v42, %v2915_v50  ;;  %v2924_v12 = vmul.f32 %v3569_v5, %v2917_v61 }
 0x45d   : > { %v2923_v41 = vmul.f32 %v3568_v48, %v2916_v6  ;;  %v2918_v55 = vadd.f32 %v2916_v6, %v2915_v50 }
 0x45f   : > { %v2919_v18 = vadd.f32 %v2918_v55, %v2917_v61  ;;  %v2925_v40 = vadd.f32 %v2923_v41, %v2922_v39 }
 0x461   : > { %2920 = vadd.xlane.f32.xlu1 %v2919_v18  ;;  %v2926_v37 = vadd.f32 %v2925_v40, %v2924_v12 }
 0x463   : > { %2927 = vadd.xlane.f32.xlu0 %v2926_v37 }
 0x4ee   : > { %v2921_v59 = vpop.xlane.xlu1 %2920 }
 0x4ef   : > { %v2929_v27 = vmul.f32 0.00390625, %v2921_v59 }
 0x4f0   : > { %v2928_v7 = vpop.xlane.xlu0 %2927 }
 0x4f1   : > { %v2930_v31 = vmul.f32 0.00390625, %v2928_v7  ;;  %v2931_v29 = vmul.f32 %v2929_v27, %v2929_v27  ;;  %v2934_v26 = vsub.f32 %v3567_v42, %v2929_v27  ;;  %v2935_v45 = vsub.f32 %v3568_v48, %v2929_v27 }
 0x4f2   : > { %v2936_v44 = vsub.f32 %v3569_v5, %v2929_v27 }
 0x4f3   : > { %v2932_v19 = vsub.f32 %v2930_v31, %v2931_v29 }
 0x4f5   : > { %v2933_v38 = vmax.f32 %v2932_v19, 0.0 }
 0x4f7   : > { %v2937_v47 = vadd.f32 1e-05, %v2933_v38 }
 0x4f9   : > { %3636 = vrsqrt.f32 %v2937_v47 }
 0x503   : > { %v3637_v8 = vpop.eup %3636 }
 0x504   : > { %v2939_v34 = vmul.f32 %v3637_v8, %v2934_v26  ;;  %v2940_v36 = vmul.f32 %v3637_v8, %v2935_v45  ;;  %v2941_v0 = vmul.f32 %v3637_v8, %v2936_v44 }
 0x506   : > { %v2942_v10 = vmax.f32 %v2939_v34, 0.0  ;;  %v2943_v23 = vmax.f32 %v2940_v36, 0.0  ;;  %v2944_v53 = vmax.f32 %v2941_v0, 0.0 }
 0x508   : > { %2945 = vst [vmem:[%s251_s26] sm:$0xff] %v2942_v10  ;;  %2946 = vst [vmem:[%s251_s26 + $0x8] sm:$0xff] %v2943_v23 }
 0x509   : > { %2947 = vst [vmem:[%s251_s26 + $0x10] sm:$0xff] %v2944_v53 }
 0x50a PF: > { %s16_s21 = sadd.s32 1, %s3644_s21  }
 0x50b   : > { %p13_p4 = scmp.ge.s32.totalorder %s16_s21, 4  }
 0x50d   :  { %15 = sbr.rel (!%p13_p4) target bundleno = 1 (0x1), region = 74 }

</bundles_post_ra>
